<compile_context>
chip_gen: v7x
topology: tpu7x:2x2x1
jax: 0.10.0
libtpu: 0.0.40
codegen_flags: <defaults>
</compile_context>

<pallas_src>
import functools
import math

import jax
import jax.numpy as jnp
from jax.experimental import pallas as pl
from jax.experimental.pallas import tpu as pltpu

PAD = 128          # padded hidden-feature width (lane-aligned)
N_LAYERS = 9


def _layer_dims(input_size):
    # (in_features, out_features) in forward() application order.
    return [(input_size, 14), (14, 15), (15, 30), (30, 40), (40, 30),
            (30, 15), (15, 5), (5, 3), (3, 1)]


def _round_up(n, m):
    return ((n + m - 1) // m) * m


def simplenet_kernel(x_ref, w_ref, b_ref, o_ref, *, d_in_pad):
    """x_ref: (b_tile, d_in_pad) f32; w_ref: (9,128,128) bf16;
    b_ref: (9,1,128) f32; o_ref: (b_tile, 1) f32."""
    # Layer 0: narrow contraction over the (sublane-padded) real input width.
    h = x_ref[...].astype(jnp.bfloat16)
    w0 = w_ref[0][:d_in_pad, :]                       # (d_in_pad, 128) bf16
    y = jnp.dot(h, w0, preferred_element_type=jnp.float32) + b_ref[0]
    h = jnp.maximum(y, 0.0)
    # Remaining 8 layers on the 128-lane padded hidden state.
    for i in range(1, N_LAYERS):
        y = jnp.dot(h.astype(jnp.bfloat16), w_ref[i],
                    preferred_element_type=jnp.float32) + b_ref[i]
        if i < N_LAYERS - 1:
            y = jnp.maximum(y, 0.0)                   # ReLU on hidden layers; l6 linear
        h = y
    # Only lane 0 of the final layer is real -> narrow writeback.
    o_ref[...] = h[:, :1]


def init_params(key, input_size):
    """PyTorch-style uniform(-1/sqrt(fan_in), 1/sqrt(fan_in)) init, packed+padded.

    Returns:
      w_stack: (9, 128, 128) bf16, layer i weight stored [in, out], zero-padded.
      b_stack: (9, 1, 128)  f32,  layer i bias, zero-padded.
    Padded rows/cols/lanes stay exactly 0.0 (required for correctness).
    """
    assert input_size <= PAD
    w_stack = jnp.zeros((N_LAYERS, PAD, PAD), jnp.float32)
    b_stack = jnp.zeros((N_LAYERS, 1, PAD), jnp.float32)
    for i, (d_in, d_out) in enumerate(_layer_dims(input_size)):
        key, kw, kb = jax.random.split(key, 3)
        bound = 1.0 / math.sqrt(d_in)
        w = jax.random.uniform(kw, (d_in, d_out), jnp.float32, -bound, bound)
        b = jax.random.uniform(kb, (d_out,), jnp.float32, -bound, bound)
        w_stack = w_stack.at[i, :d_in, :d_out].set(w)
        b_stack = b_stack.at[i, 0, :d_out].set(b)
    return w_stack.astype(jnp.bfloat16), b_stack


def simplenet_forward(x, w_stack, b_stack, *, b_tile=4096):
    """x: (B, input_size) f32 -> (B, 1) f32."""
    B, d_in = x.shape
    assert d_in <= PAD
    d_in_pad = _round_up(d_in, 8)                      # sublane-aligned input width

    # Pick the batch tile: big (amortize per-step overhead), but never larger
    # than needed, and capped so the grid has >=2 steps when possible
    # (lets the 'parallel' axis shard across both TensorCores on v7x).
    b_req = _round_up(max(min(b_tile, _round_up(B, 8)), 8), 8)
    half = _round_up(max(_round_up(B, 8) // 2, 8), 8)
    b_tile = max(8, min(b_req, half))
    B_pad = _round_up(B, b_tile)

    if (B_pad, d_in_pad) != (B, d_in):
        x_in = jnp.zeros((B_pad, d_in_pad), jnp.float32).at[:B, :d_in].set(x)
    else:
        x_in = x.astype(jnp.float32)

    grid = (B_pad // b_tile,)
    flops = 2 * B_pad * (d_in_pad * PAD + (N_LAYERS - 1) * PAD * PAD)
    bytes_accessed = (x_in.size * 4 + w_stack.size * 2
                      + b_stack.size * 4 + B_pad * 4)

    out = pl.pallas_call(
        functools.partial(simplenet_kernel, d_in_pad=d_in_pad),
        out_shape=jax.ShapeDtypeStruct((B_pad, 1), jnp.float32),
        grid=grid,
        in_specs=[
            # streamed activations: one (b_tile, d_in_pad) block per grid step
            pl.BlockSpec((b_tile, d_in_pad), lambda i: (i, 0)),
            # packed bf16 weights / f32 biases: constant block index -> fetched
            # once, stay VMEM-resident across all batch tiles
            pl.BlockSpec((N_LAYERS, PAD, PAD), lambda i: (0, 0, 0)),
            pl.BlockSpec((N_LAYERS, 1, PAD), lambda i: (0, 0, 0)),
        ],
        out_specs=pl.BlockSpec((b_tile, 1), lambda i: (i, 0)),
        compiler_params=pltpu.CompilerParams(
            dimension_semantics=("parallel",),
            vmem_limit_bytes=32 * 1024 * 1024),
        cost_estimate=pl.CostEstimate(
            flops=flops, transcendentals=0, bytes_accessed=bytes_accessed),
    )(x_in, w_stack, b_stack)
    return out[:B, :]


def simplenet_reference(x, w_stack, b_stack):
    """Plain-JAX reference mirroring the kernel numerics (bf16 inputs, f32 accum)."""
    B, d_in = x.shape
    d_in_pad = _round_up(d_in, 8)
    h = jnp.zeros((B, d_in_pad), jnp.float32).at[:, :d_in].set(x)
    w_f32 = w_stack.astype(jnp.float32)
    y = jnp.dot(h.astype(jnp.bfloat16).astype(jnp.float32),
                w_f32[0][:d_in_pad, :],
                precision=jax.lax.Precision.HIGHEST) + b_stack[0]
    h = jnp.maximum(y, 0.0)
    for i in range(1, N_LAYERS):
        y = jnp.dot(h.astype(jnp.bfloat16).astype(jnp.float32), w_f32[i],
                    precision=jax.lax.Precision.HIGHEST) + b_stack[i]
        if i < N_LAYERS - 1:
            y = jnp.maximum(y, 0.0)
        h = y
    return h[:, :1]


if __name__ == "__main__":
    key = jax.random.PRNGKey(0)
    k_params, k_x = jax.random.split(key)

    input_size = 16   # stand-in for trainDatas.shape[1]
    batch = 200       # deliberately not a multiple of the tile size

    w_stack, b_stack = init_params(k_params, input_size)
    x = jax.random.normal(k_x, (batch, input_size), jnp.float32)

    # Default tiling: b_tile is auto-capped to 104 here -> 2-step batch grid.
    y = simplenet_forward(x, w_stack, b_stack)
    jax.block_until_ready(y)

    y_ref = simplenet_reference(x, w_stack, b_stack)
    assert y.shape == (batch, 1)
    assert jnp.allclose(y, y_ref, atol=1e-2, rtol=1e-2)

    # TODO(synk): training loop / optimizer / LR scheduler / TensorBoard parts of
    # the original script are host-side and out of scope for the forward kernel.
    print("KERNEL_OK")
</pallas_src>

<mosaic_0001>
module attributes {stable_mosaic.version = 11 : i64} {
  func.func @simplenet_kernel(%arg0: i32, %arg1: memref<104x16xf32, #tpu.memory_space<vmem>>, %arg2: memref<9x128x128xbf16, #tpu.memory_space<vmem>>, %arg3: memref<9x1x128xf32, #tpu.memory_space<vmem>>, %arg4: memref<104x1xf32, #tpu.memory_space<vmem>>) attributes {dimension_semantics = [#tpu.dimension_semantics<parallel>], iteration_bounds = array<i64: 2>, scalar_prefetch = 0 : i64, scratch_operands = 0 : i64, tpu.core_type = #tpu.core_type<tc>, window_params = [{transform_indices = @transform_0, window_bounds = array<i64: 104, 16>}, {pipeline_mode = #tpu.pipeline_mode<synchronous>, transform_indices = @transform_1, window_bounds = array<i64: 9, 128, 128>}, {pipeline_mode = #tpu.pipeline_mode<synchronous>, transform_indices = @transform_2, window_bounds = array<i64: 9, 1, 128>}, {transform_indices = @transform_3, window_bounds = array<i64: 104, 1>}]} {
    %c0 = arith.constant 0 : index
    %c0_0 = arith.constant 0 : index
    %0 = vector.load %arg1[%c0, %c0_0] : memref<104x16xf32, #tpu.memory_space<vmem>>, vector<104x16xf32>
    %1 = arith.truncf %0 : vector<104x16xf32> to vector<104x16xbf16>
    %c0_1 = arith.constant 0 : index
    %c0_2 = arith.constant 0 : index
    %c0_3 = arith.constant 0 : index
    %2 = vector.load %arg2[%c0_1, %c0_2, %c0_3] : memref<9x128x128xbf16, #tpu.memory_space<vmem>>, vector<1x128x128xbf16>
    %3 = vector.shape_cast %2 : vector<1x128x128xbf16> to vector<128x128xbf16>
    %4 = vector.extract_strided_slice %3 {offsets = [0, 0], sizes = [16, 128], strides = [1, 1]} : vector<128x128xbf16> to vector<16x128xbf16>
    %cst = arith.constant dense<0.000000e+00> : vector<104x128xf32>
    %5 = tpu.matmul %1, %4, %cst {dimension_numbers = #tpu.dot_dimension_numbers<[1], [0], [0], [1], [0, 0, 1, 1], [], []>} : vector<104x16xbf16>, vector<16x128xbf16>, vector<104x128xf32> -> vector<104x128xf32>
    %c0_4 = arith.constant 0 : index
    %c0_5 = arith.constant 0 : index
    %c0_6 = arith.constant 0 : index
    %6 = vector.load %arg3[%c0_4, %c0_5, %c0_6] : memref<9x1x128xf32, #tpu.memory_space<vmem>>, vector<1x1x128xf32>
    %7 = vector.shape_cast %6 : vector<1x1x128xf32> to vector<1x128xf32>
    %8 = vector.broadcast %7 : vector<1x128xf32> to vector<104x128xf32>
    %9 = arith.addf %5, %8 : vector<104x128xf32>
    %cst_7 = arith.constant 0.000000e+00 : f32
    %10 = vector.broadcast %cst_7 : f32 to vector<104x128xf32>
    %11 = arith.maximumf %9, %10 : vector<104x128xf32>
    %12 = arith.truncf %11 : vector<104x128xf32> to vector<104x128xbf16>
    %c1 = arith.constant 1 : index
    %c0_8 = arith.constant 0 : index
    %c0_9 = arith.constant 0 : index
    %13 = vector.load %arg2[%c1, %c0_8, %c0_9] : memref<9x128x128xbf16, #tpu.memory_space<vmem>>, vector<1x128x128xbf16>
    %14 = vector.shape_cast %13 : vector<1x128x128xbf16> to vector<128x128xbf16>
    %cst_10 = arith.constant dense<0.000000e+00> : vector<104x128xf32>
    %15 = tpu.matmul %12, %14, %cst_10 {dimension_numbers = #tpu.dot_dimension_numbers<[1], [0], [0], [1], [0, 0, 1, 1], [], []>} : vector<104x128xbf16>, vector<128x128xbf16>, vector<104x128xf32> -> vector<104x128xf32>
    %c1_11 = arith.constant 1 : index
    %c0_12 = arith.constant 0 : index
    %c0_13 = arith.constant 0 : index
    %16 = vector.load %arg3[%c1_11, %c0_12, %c0_13] : memref<9x1x128xf32, #tpu.memory_space<vmem>>, vector<1x1x128xf32>
    %17 = vector.shape_cast %16 : vector<1x1x128xf32> to vector<1x128xf32>
    %18 = vector.broadcast %17 : vector<1x128xf32> to vector<104x128xf32>
    %19 = arith.addf %15, %18 : vector<104x128xf32>
    %cst_14 = arith.constant 0.000000e+00 : f32
    %20 = vector.broadcast %cst_14 : f32 to vector<104x128xf32>
    %21 = arith.maximumf %19, %20 : vector<104x128xf32>
    %22 = arith.truncf %21 : vector<104x128xf32> to vector<104x128xbf16>
    %c2 = arith.constant 2 : index
    %c0_15 = arith.constant 0 : index
    %c0_16 = arith.constant 0 : index
    %23 = vector.load %arg2[%c2, %c0_15, %c0_16] : memref<9x128x128xbf16, #tpu.memory_space<vmem>>, vector<1x128x128xbf16>
    %24 = vector.shape_cast %23 : vector<1x128x128xbf16> to vector<128x128xbf16>
    %cst_17 = arith.constant dense<0.000000e+00> : vector<104x128xf32>
    %25 = tpu.matmul %22, %24, %cst_17 {dimension_numbers = #tpu.dot_dimension_numbers<[1], [0], [0], [1], [0, 0, 1, 1], [], []>} : vector<104x128xbf16>, vector<128x128xbf16>, vector<104x128xf32> -> vector<104x128xf32>
    %c2_18 = arith.constant 2 : index
    %c0_19 = arith.constant 0 : index
    %c0_20 = arith.constant 0 : index
    %26 = vector.load %arg3[%c2_18, %c0_19, %c0_20] : memref<9x1x128xf32, #tpu.memory_space<vmem>>, vector<1x1x128xf32>
    %27 = vector.shape_cast %26 : vector<1x1x128xf32> to vector<1x128xf32>
    %28 = vector.broadcast %27 : vector<1x128xf32> to vector<104x128xf32>
    %29 = arith.addf %25, %28 : vector<104x128xf32>
    %cst_21 = arith.constant 0.000000e+00 : f32
    %30 = vector.broadcast %cst_21 : f32 to vector<104x128xf32>
    %31 = arith.maximumf %29, %30 : vector<104x128xf32>
    %32 = arith.truncf %31 : vector<104x128xf32> to vector<104x128xbf16>
    %c3 = arith.constant 3 : index
    %c0_22 = arith.constant 0 : index
    %c0_23 = arith.constant 0 : index
    %33 = vector.load %arg2[%c3, %c0_22, %c0_23] : memref<9x128x128xbf16, #tpu.memory_space<vmem>>, vector<1x128x128xbf16>
    %34 = vector.shape_cast %33 : vector<1x128x128xbf16> to vector<128x128xbf16>
    %cst_24 = arith.constant dense<0.000000e+00> : vector<104x128xf32>
    %35 = tpu.matmul %32, %34, %cst_24 {dimension_numbers = #tpu.dot_dimension_numbers<[1], [0], [0], [1], [0, 0, 1, 1], [], []>} : vector<104x128xbf16>, vector<128x128xbf16>, vector<104x128xf32> -> vector<104x128xf32>
    %c3_25 = arith.constant 3 : index
    %c0_26 = arith.constant 0 : index
    %c0_27 = arith.constant 0 : index
    %36 = vector.load %arg3[%c3_25, %c0_26, %c0_27] : memref<9x1x128xf32, #tpu.memory_space<vmem>>, vector<1x1x128xf32>
    %37 = vector.shape_cast %36 : vector<1x1x128xf32> to vector<1x128xf32>
    %38 = vector.broadcast %37 : vector<1x128xf32> to vector<104x128xf32>
    %39 = arith.addf %35, %38 : vector<104x128xf32>
    %cst_28 = arith.constant 0.000000e+00 : f32
    %40 = vector.broadcast %cst_28 : f32 to vector<104x128xf32>
    %41 = arith.maximumf %39, %40 : vector<104x128xf32>
    %42 = arith.truncf %41 : vector<104x128xf32> to vector<104x128xbf16>
    %c4 = arith.constant 4 : index
    %c0_29 = arith.constant 0 : index
    %c0_30 = arith.constant 0 : index
    %43 = vector.load %arg2[%c4, %c0_29, %c0_30] : memref<9x128x128xbf16, #tpu.memory_space<vmem>>, vector<1x128x128xbf16>
    %44 = vector.shape_cast %43 : vector<1x128x128xbf16> to vector<128x128xbf16>
    %cst_31 = arith.constant dense<0.000000e+00> : vector<104x128xf32>
    %45 = tpu.matmul %42, %44, %cst_31 {dimension_numbers = #tpu.dot_dimension_numbers<[1], [0], [0], [1], [0, 0, 1, 1], [], []>} : vector<104x128xbf16>, vector<128x128xbf16>, vector<104x128xf32> -> vector<104x128xf32>
    %c4_32 = arith.constant 4 : index
    %c0_33 = arith.constant 0 : index
    %c0_34 = arith.constant 0 : index
    %46 = vector.load %arg3[%c4_32, %c0_33, %c0_34] : memref<9x1x128xf32, #tpu.memory_space<vmem>>, vector<1x1x128xf32>
    %47 = vector.shape_cast %46 : vector<1x1x128xf32> to vector<1x128xf32>
    %48 = vector.broadcast %47 : vector<1x128xf32> to vector<104x128xf32>
    %49 = arith.addf %45, %48 : vector<104x128xf32>
    %cst_35 = arith.constant 0.000000e+00 : f32
    %50 = vector.broadcast %cst_35 : f32 to vector<104x128xf32>
    %51 = arith.maximumf %49, %50 : vector<104x128xf32>
    %52 = arith.truncf %51 : vector<104x128xf32> to vector<104x128xbf16>
    %c5 = arith.constant 5 : index
    %c0_36 = arith.constant 0 : index
    %c0_37 = arith.constant 0 : index
    %53 = vector.load %arg2[%c5, %c0_36, %c0_37] : memref<9x128x128xbf16, #tpu.memory_space<vmem>>, vector<1x128x128xbf16>
    %54 = vector.shape_cast %53 : vector<1x128x128xbf16> to vector<128x128xbf16>
    %cst_38 = arith.constant dense<0.000000e+00> : vector<104x128xf32>
    %55 = tpu.matmul %52, %54, %cst_38 {dimension_numbers = #tpu.dot_dimension_numbers<[1], [0], [0], [1], [0, 0, 1, 1], [], []>} : vector<104x128xbf16>, vector<128x128xbf16>, vector<104x128xf32> -> vector<104x128xf32>
    %c5_39 = arith.constant 5 : index
    %c0_40 = arith.constant 0 : index
    %c0_41 = arith.constant 0 : index
    %56 = vector.load %arg3[%c5_39, %c0_40, %c0_41] : memref<9x1x128xf32, #tpu.memory_space<vmem>>, vector<1x1x128xf32>
    %57 = vector.shape_cast %56 : vector<1x1x128xf32> to vector<1x128xf32>
    %58 = vector.broadcast %57 : vector<1x128xf32> to vector<104x128xf32>
    %59 = arith.addf %55, %58 : vector<104x128xf32>
    %cst_42 = arith.constant 0.000000e+00 : f32
    %60 = vector.broadcast %cst_42 : f32 to vector<104x128xf32>
    %61 = arith.maximumf %59, %60 : vector<104x128xf32>
    %62 = arith.truncf %61 : vector<104x128xf32> to vector<104x128xbf16>
    %c6 = arith.constant 6 : index
    %c0_43 = arith.constant 0 : index
    %c0_44 = arith.constant 0 : index
    %63 = vector.load %arg2[%c6, %c0_43, %c0_44] : memref<9x128x128xbf16, #tpu.memory_space<vmem>>, vector<1x128x128xbf16>
    %64 = vector.shape_cast %63 : vector<1x128x128xbf16> to vector<128x128xbf16>
    %cst_45 = arith.constant dense<0.000000e+00> : vector<104x128xf32>
    %65 = tpu.matmul %62, %64, %cst_45 {dimension_numbers = #tpu.dot_dimension_numbers<[1], [0], [0], [1], [0, 0, 1, 1], [], []>} : vector<104x128xbf16>, vector<128x128xbf16>, vector<104x128xf32> -> vector<104x128xf32>
    %c6_46 = arith.constant 6 : index
    %c0_47 = arith.constant 0 : index
    %c0_48 = arith.constant 0 : index
    %66 = vector.load %arg3[%c6_46, %c0_47, %c0_48] : memref<9x1x128xf32, #tpu.memory_space<vmem>>, vector<1x1x128xf32>
    %67 = vector.shape_cast %66 : vector<1x1x128xf32> to vector<1x128xf32>
    %68 = vector.broadcast %67 : vector<1x128xf32> to vector<104x128xf32>
    %69 = arith.addf %65, %68 : vector<104x128xf32>
    %cst_49 = arith.constant 0.000000e+00 : f32
    %70 = vector.broadcast %cst_49 : f32 to vector<104x128xf32>
    %71 = arith.maximumf %69, %70 : vector<104x128xf32>
    %72 = arith.truncf %71 : vector<104x128xf32> to vector<104x128xbf16>
    %c7 = arith.constant 7 : index
    %c0_50 = arith.constant 0 : index
    %c0_51 = arith.constant 0 : index
    %73 = vector.load %arg2[%c7, %c0_50, %c0_51] : memref<9x128x128xbf16, #tpu.memory_space<vmem>>, vector<1x128x128xbf16>
    %74 = vector.shape_cast %73 : vector<1x128x128xbf16> to vector<128x128xbf16>
    %cst_52 = arith.constant dense<0.000000e+00> : vector<104x128xf32>
    %75 = tpu.matmul %72, %74, %cst_52 {dimension_numbers = #tpu.dot_dimension_numbers<[1], [0], [0], [1], [0, 0, 1, 1], [], []>} : vector<104x128xbf16>, vector<128x128xbf16>, vector<104x128xf32> -> vector<104x128xf32>
    %c7_53 = arith.constant 7 : index
    %c0_54 = arith.constant 0 : index
    %c0_55 = arith.constant 0 : index
    %76 = vector.load %arg3[%c7_53, %c0_54, %c0_55] : memref<9x1x128xf32, #tpu.memory_space<vmem>>, vector<1x1x128xf32>
    %77 = vector.shape_cast %76 : vector<1x1x128xf32> to vector<1x128xf32>
    %78 = vector.broadcast %77 : vector<1x128xf32> to vector<104x128xf32>
    %79 = arith.addf %75, %78 : vector<104x128xf32>
    %cst_56 = arith.constant 0.000000e+00 : f32
    %80 = vector.broadcast %cst_56 : f32 to vector<104x128xf32>
    %81 = arith.maximumf %79, %80 : vector<104x128xf32>
    %82 = arith.truncf %81 : vector<104x128xf32> to vector<104x128xbf16>
    %c8 = arith.constant 8 : index
    %c0_57 = arith.constant 0 : index
    %c0_58 = arith.constant 0 : index
    %83 = vector.load %arg2[%c8, %c0_57, %c0_58] : memref<9x128x128xbf16, #tpu.memory_space<vmem>>, vector<1x128x128xbf16>
    %84 = vector.shape_cast %83 : vector<1x128x128xbf16> to vector<128x128xbf16>
    %cst_59 = arith.constant dense<0.000000e+00> : vector<104x128xf32>
    %85 = tpu.matmul %82, %84, %cst_59 {dimension_numbers = #tpu.dot_dimension_numbers<[1], [0], [0], [1], [0, 0, 1, 1], [], []>} : vector<104x128xbf16>, vector<128x128xbf16>, vector<104x128xf32> -> vector<104x128xf32>
    %c8_60 = arith.constant 8 : index
    %c0_61 = arith.constant 0 : index
    %c0_62 = arith.constant 0 : index
    %86 = vector.load %arg3[%c8_60, %c0_61, %c0_62] : memref<9x1x128xf32, #tpu.memory_space<vmem>>, vector<1x1x128xf32>
    %87 = vector.shape_cast %86 : vector<1x1x128xf32> to vector<1x128xf32>
    %88 = vector.broadcast %87 : vector<1x128xf32> to vector<104x128xf32>
    %89 = arith.addf %85, %88 : vector<104x128xf32>
    %90 = vector.extract_strided_slice %89 {offsets = [0, 0], sizes = [104, 1], strides = [1, 1]} : vector<104x128xf32> to vector<104x1xf32>
    %c0_63 = arith.constant 0 : index
    %c0_64 = arith.constant 0 : index
    %91 = vector.load %arg4[%c0_63, %c0_64] : memref<104x1xf32, #tpu.memory_space<vmem>>, vector<104x1xf32>
    tpu.vector_store %arg4[%c0_63, %c0_64], %90 {strides = array<i32>} : memref<104x1xf32, #tpu.memory_space<vmem>>, vector<104x1xf32>,
    return
  }
  func.func @transform_0(%arg0: i32) -> (i32, i32) {
    %c0_i32 = arith.constant 0 : i32
    %c0_i32_0 = arith.constant 0 : i32
    return %arg0, %c0_i32 : i32, i32
  }
  func.func @transform_1(%arg0: i32) -> (i32, i32, i32) {
    %c0_i32 = arith.constant 0 : i32
    %c0_i32_0 = arith.constant 0 : i32
    %c0_i32_1 = arith.constant 0 : i32
    %c0_i32_2 = arith.constant 0 : i32
    return %c0_i32, %c0_i32_0, %c0_i32_1 : i32, i32, i32
  }
  func.func @transform_2(%arg0: i32) -> (i32, i32, i32) {
    %c0_i32 = arith.constant 0 : i32
    %c0_i32_0 = arith.constant 0 : i32
    %c0_i32_1 = arith.constant 0 : i32
    %c0_i32_2 = arith.constant 0 : i32
    return %c0_i32, %c0_i32_0, %c0_i32_1 : i32, i32, i32
  }
  func.func @transform_3(%arg0: i32) -> (i32, i32) {
    %c0_i32 = arith.constant 0 : i32
    %c0_i32_0 = arith.constant 0 : i32
    return %arg0, %c0_i32 : i32, i32
  }
}

</mosaic_0001>

<bundles_post_ra>
// kernel: tpu_custom_call.1
= control target key start
LH: loop header
LB: loop body
LE: loop exit
PB: predicated region body
PF: predicated region fallthrough
CT: control target
= control target key end

     0   :  { %8 = vsyncpa [#allocation3], 0  ;;  %s2630_s12 = smov 0   ;;  %s3085_s0 = inlined_call_operand.vmem [shape: f32[208,16], index: 0, kind: input, shape index: {}]   ;;  %s3086_s1 = inlined_call_operand.hbm [shape: bf16[9,128,128], index: 1, kind: input, shape index: {}]   ;;  %s3087_s2 = inlined_call_operand.vmem [shape: f32[9,1,128], index: 2, kind: input, shape index: {}]   ;;  %s3088_s3 = inlined_call_operand.vmem [shape: f32[208,1], index: 3, kind: output, shape index: {}]  }
   0x1 LB: > { %s1865_s13 = sadd.s32 4294967295, %s2603_s12   ;;  %p1867_p0 = scmp.ge.s32.totalorder %s2603_s12, 1  ;;  %s2603_s12 = sphi %s2630_s12, %s14_s12  }
   0x2   : > { %p113_p1 = scmp.lt.s32.totalorder %s2603_s12, 3  ;;  %s2605_s14 = smov [#allocation2]  }
   0x3   : > { %s125_s15 = sshll.u32 %s2605_s14, 4  ;;  %p2644_p3 = scmp.eq.s32.totalorder %s1865_s13, 0  ;;  %s126_s15 = int_to_ptr.vmem [resolvable:$true] %s125_s15 }
   0x4   : > { %p2638_p2 = pnand %p1867_p0, %p113_p1  ;;  %s2565_s21 = scalar_lea.hbm %s3086_s1, 9216 }
   0x5   : > { %s3093_s17 = scalar_select %p2644_p3, 1, 0 }
   0x6   : > { %s3092_s16 = scalar_select %p2638_p2, 1, 0 }
   0x7   : > { %p2481_p4 = pneg %p2638_p2  ;;  %p2566_p6 = scmp.ne.s32.totalorder %s3086_s1, %s2565_s21 }
   0x8   : > { %p2572_p10 = scmp.lt.u32.totalorder %s2565_s21, %s3086_s1 }
   0x9   : > { %p2652_p5 = pnand %p2644_p3, %p2481_p4 }
   0xb   : > { %p2567_p7 = pneg %p2652_p5 }
   0xd   : > { %p2568_p8 = pnand %p2567_p7, %p2566_p6 }
   0xf   : > { %p2569_p9 = pneg %p2568_p8 }
  0x11   : > { %p2574_p11 = pnand %p2572_p10, %p2569_p9 }
  0x13   : > { %2577 = shalt.err (!%p2574_p11)
}
  0x14   : > { %s2578_s26 = scalar_lea.vmem %s126_s15, 9216  ;;  %p2586_p1 = scmp.lt.s32.totalorder %s126_s15, %s126_s15 }
  0x15   : > { %p2579_p12 = scmp.ne.s32.totalorder %s126_s15, %s2578_s26  ;;  %p2587_p4 = scmp.lt.s32.totalorder %s2578_s26, %s2578_s26 }
  0x17   : > { %p2581_p13 = pnand %p2579_p12, %p2567_p7  ;;  %p2588_p3 = por %p2587_p4, %p2586_p1 }
  0x19   : > { %p2582_p0 = pneg %p2581_p13 }
  0x1b   : > { %p2589_p2 = pnand %p2588_p3, %p2582_p0 }
  0x1d   : > { %2592 = shalt.err (!%p2589_p2)
}
  0x1e   : > { %s2606_s27 = smov 64   ;;  %s2607_s28 = smov 4  }
  0x1f   : > { %2484 = dma.hbm_to_vmem [thread:$0]  (!%p2652_p5), %s3086_s1, 9216, %s126_s15, [#allocation3], %s2606_s27, %s2606_s27, %s2607_s28  }
  0x20   : > { %p3095_p6 = scmp.ne.s32.totalorder %s3092_s16, 0 }
  0x21   : > { %p3096_p8 = scmp.ne.s32.totalorder (!%p3095_p6), %s3093_s17, 0 }
  0x22   : > { %153 = sbr.rel (%p3095_p6) target bundleno = 2075 (0x81b), region = 32 }
  0x29   : > { %2598 = dma.done.wait (%p3096_p8), [#allocation3], 9216  }
  0x2a   : > { %2600 = vsyncadd (%p3096_p8), [#allocation3], 4294958080  ;;  %s177_s4 = smul.u32 13, %s1865_s13  ;;  %v2608_v0 = vmov 0.0   ;;  %vm2609_vm0 = vmmov 0   ;;  %v2500_v1 = vld [vmem:[#allocation2] sm:$0xff]  }
  0x2b   : > { %2093 = vmatprep.subr.bf16.mxu0 %v2608_v0  ;;  %2095 = vmatprep.mubr.msk.bf16.mxu0 %vm2609_vm0, %v2608_v0  ;;  %vm225_vm1 = vcmask 130048   ;;  %v2501_v11 = vld [vmem:[#allocation2 + $0x40] sm:$0xff]   ;;  %v2502_v13 = vld [vmem:[#allocation2 + $0x48] sm:$0xff]   ;;  %v2503_v16 = vld [vmem:[#allocation2 + $0x50] sm:$0xff]   ;;  %vm1783_vm2 = vcmask 7168  }
  0x2c   : > { %p178_p2 = scmp.lt.s32.totalorder %s177_s4, 25  ;;  %2475 = vmatprep.subr.bf16.mxu1 %v2608_v0  ;;  %2111 = vmatprep.mubr.msk.bf16.mxu1 %vm2609_vm0, %v2608_v0  ;;  %v2504_v20 = vld [vmem:[#allocation2 + $0x58] sm:$0xff]   ;;  %v2505_v22 = vld [vmem:[#allocation2 + $0x60] sm:$0xff]   ;;  %v2506_v26 = vld [vmem:[#allocation2 + $0x68] sm:$0xff]  }
  0x2d   : > { %2094 = vmatpush3.bf16.msra.mxu0 %v2500_v1  ;;  %2476 = vmatpush3.bf16.msra.mxu1 %v2500_v1  ;;  %v2507_v28 = vld [vmem:[#allocation2 + $0x70] sm:$0xff]   ;;  %v2508_v29 = vld [vmem:[#allocation2 + $0x78] sm:$0xff]   ;;  %v2509_v30 = vld [vmem:[#allocation2 + $0x80] sm:$0xff]  }
  0x2e   : > { %s3098_s4 = smov (!%p178_p2, %s177_s4), 25  ;;  %2123 = vmatprep.subr.bf16.mxu1 %v2608_v0  ;;  %2167 = vmatprep.subr.bf16.mxu0 %v2608_v0  ;;  %v2510_v31 = vld [vmem:[#allocation2 + $0x88] sm:$0xff]   ;;  %v2511_v32 = vld [vmem:[#allocation2 + $0x90] sm:$0xff]   ;;  %v2512_v33 = vld [vmem:[#allocation2 + $0x98] sm:$0xff]  }
  0x2f   : > { %s1872_s5 = sshll.u32 %s3098_s4, 3  ;;  %v2513_v34 = vld [vmem:[#allocation2 + $0xa0] sm:$0xff]   ;;  %v2514_v35 = vld [vmem:[#allocation2 + $0xa8] sm:$0xff]  }
  0x30   : > { %s2694_s8 = scalar_lea.vmem %s3085_s0, %s1872_s5  ;;  %v2749_v36 = vld [vmem:[%s3087_s2] ss:$0 sm:$0xff]  ;;  %s3054_s30 = scalar_lea.vmem %s3088_s3, %s1872_s5 }
  0x31   : > { %v190_v2 = vld [vmem:[%s2694_s8] sm:$0xff]  ;;  %v191_v3 = vld [vmem:[%s2694_s8 + $0x8] sm:$0xff]  ;;  %v192_v6 = vld [vmem:[%s2694_s8 + $0x10] sm:$0xff] }
  0x32   : > { %v203_v4 = vpack.c.bf16 %v191_v3, %v190_v2  ;;  %v198_v5 = vld [vmem:[%s2694_s8 + $0x40] sm:$0xff]  ;;  %v199_v7 = vld [vmem:[%s2694_s8 + $0x48] sm:$0xff]  ;;  %v193_v8 = vld [vmem:[%s2694_s8 + $0x18] sm:$0xff] }
  0x33   : > { %v207_v9 = vpack.c.bf16 %v199_v7, %v198_v5  ;;  %v200_v10 = vld [vmem:[%s2694_s8 + $0x50] sm:$0xff]  ;;  %v201_v12 = vld [vmem:[%s2694_s8 + $0x58] sm:$0xff]  ;;  %v204_v14 = vpack.c.bf16 %v193_v8, %v192_v6  ;;  %v194_v17 = vld [vmem:[%s2694_s8 + $0x20] sm:$0xff] }
  0x34   : > { %2096 = vmatmul.mubr.msk.bf16.vlgmr.msra.gmra.mrb[0].mxu0 %vm225_vm1, %v203_v4  ;;  %v208_v15 = vpack.c.bf16 %v201_v12, %v200_v10  ;;  %v195_v18 = vld [vmem:[%s2694_s8 + $0x28] sm:$0xff]  ;;  %v202_v19 = vld [vmem:[%s2694_s8 + $0x60] sm:$0xff]  ;;  %v196_v24 = vld [vmem:[%s2694_s8 + $0x30] sm:$0xff] }
  0x35   : > { %2099 = vmatprep.mubr.msk.bf16.mxu0 %vm2609_vm0, %v2608_v0  ;;  %2112 = vmatmul.mubr.msk.bf16.vlgmr.msra.gmra.mrb[0].mxu1 %vm225_vm1, %v207_v9  ;;  %v205_v21 = vpack.c.bf16 %v195_v18, %v194_v17  ;;  %v209_v23 = vpack.c.bf16 %v202_v19, %v202_v19  ;;  %v197_v25 = vld [vmem:[%s2694_s8 + $0x38] sm:$0xff] }
  0x36   : > { %2115 = vmatprep.mubr.msk.bf16.mxu1 %vm2609_vm0, %v2608_v0  ;;  %2124 = vmatpush3.bf16.msra.mxu1 %v2501_v11  ;;  %v206_v27 = vpack.c.bf16 %v197_v25, %v196_v24 }
  0x37   : > { %2125 = vmatprep.subr.bf16.mxu1 %v2608_v0  ;;  %2168 = vmatpush3.bf16.msra.mxu0 %v2509_v30 }
  0x38   : > { %2169 = vmatprep.subr.bf16.mxu0 %v2608_v0 }
  0x3a   : > { %2126 = vmatpush3.bf16.msra.mxu1 %v2502_v13 }
  0x3b   : > { %2127 = vmatprep.subr.bf16.mxu1 %v2608_v0  ;;  %2170 = vmatpush3.bf16.msra.mxu0 %v2510_v31 }
  0x3c   : > { %2100 = vmatmul.mubr.msk.bf16.gmra.mrb[4].mxu0 %vm225_vm1, %v204_v14  ;;  %2171 = vmatprep.subr.bf16.mxu0 %v2608_v0 }
  0x3d   : > { %2103 = vmatprep.mubr.msk.bf16.mxu0 %vm2609_vm0, %v2608_v0  ;;  %2116 = vmatmul.mubr.msk.bf16.gmra.mrb[4].mxu1 %vm225_vm1, %v208_v15 }
  0x3e   : > { %2119 = vmatprep.mubr.msk.bf16.mxu1 %vm2609_vm0, %v2608_v0  ;;  %2128 = vmatpush3.bf16.msra.mxu1 %v2503_v16 }
  0x3f   : > { %2129 = vmatprep.subr.bf16.mxu1 %v2608_v0  ;;  %2172 = vmatpush3.bf16.msra.mxu0 %v2511_v32 }
  0x40   : > { %2173 = vmatprep.subr.bf16.mxu0 %v2608_v0 }
  0x42   : > { %2130 = vmatpush3.bf16.msra.mxu1 %v2504_v20 }
  0x43   : > { %2131 = vmatprep.subr.bf16.mxu1 %v2608_v0  ;;  %2174 = vmatpush3.bf16.msra.mxu0 %v2512_v33 }
  0x44   : > { %2104 = vmatmul.mubr.msk.bf16.gmra.mrb[8].mxu0 %vm225_vm1, %v205_v21  ;;  %2175 = vmatprep.subr.bf16.mxu0 %v2608_v0 }
  0x45   : > { %2107 = vmatprep.mubr.msk.bf16.mxu0 %vm2609_vm0, %v2608_v0  ;;  %2120 = vmatmul.mubr.msk.bf16.gmra.mrb[8].mxu1 %vm225_vm1, %v209_v23 }
  0x46   : > { %2132 = vmatpush3.bf16.msra.mxu1 %v2505_v22  ;;  %2139 = vmatprep.mubr.msk.bf16.mxu1 %vm2609_vm0, %v2608_v0 }
  0x47   : > { %2133 = vmatprep.subr.bf16.mxu1 %v2608_v0  ;;  %2176 = vmatpush3.bf16.msra.mxu0 %v2513_v34 }
  0x48   : > { %2177 = vmatprep.subr.bf16.mxu0 %v2608_v0 }
  0x4a   : > { %2134 = vmatpush3.bf16.msra.mxu1 %v2506_v26 }
  0x4b   : > { %2135 = vmatprep.subr.bf16.mxu1 %v2608_v0  ;;  %2178 = vmatpush3.bf16.msra.mxu0 %v2514_v35  ;;  %v2515_v35 = vld [vmem:[#allocation2 + $0xb0] sm:$0xff]  }
  0x4c   : > { %2108 = vmatmul.mubr.msk.bf16.gmra.mrb[12].mxu0 %vm225_vm1, %v206_v27  ;;  %2179 = vmatprep.subr.bf16.mxu0 %v2608_v0 }
  0x4d   : > { %2183 = vmatprep.mubr.msk.bf16.mxu0 %vm2609_vm0, %v2608_v0 }
  0x4e   : > { %2136 = vmatpush3.bf16.msra.mxu1 %v2507_v28 }
  0x4f   : > { %2137 = vmatprep.subr.bf16.mxu1 %v2608_v0  ;;  %2180 = vmatpush3.bf16.msra.mxu0 %v2515_v35 }
  0x50   : > { %2181 = vmatprep.subr.bf16.mxu0 %v2608_v0 }
  0x52   : > { %2138 = vmatpush3.bf16.msra.mxu1 %v2508_v29 }
  0x53   : > { %2211 = vmatprep.subr.bf16.mxu1 %v2608_v0 }
 0x107   : > { %v281_v37 = vpop.f32.mrb[0].mxu0 }
 0x108   : > { %v282_v38 = vadd.f32 %v2749_v36, %v281_v37  ;;  %v2097_v39 = vpop.f32.mrb[1].mxu0  ;;  %v313_v41 = vpop.f32.mrb[0].mxu1  ;;  %v2516_v37 = vld [vmem:[#allocation2 + $0xb8] sm:$0xff]  }
 0x109   : > { %v284_v40 = vpop.f32.mrb[2].mxu0  ;;  %v314_v44 = vadd.f32 %v2749_v36, %v313_v41  ;;  %v2113_v45 = vpop.f32.mrb[1].mxu1  ;;  %2182 = vmatpush3.bf16.msra.mxu0 %v2516_v37  ;;  %v2519_v39 = vld [vmem:[#allocation2 + $0xd0] sm:$0xff]   ;;  %v2521_v41 = vld [vmem:[#allocation2 + $0xe0] sm:$0xff]  }
 0x10a   : > { %v285_v42 = vadd.f32 %v2749_v36, %v284_v40  ;;  %v2098_v43 = vpop.f32.mrb[3].mxu0  ;;  %v316_v46 = vpop.f32.mrb[2].mxu1  ;;  %v335_v47 = vmax.f32 %v282_v38, 0.0  ;;  %2255 = vmatprep.subr.bf16.mxu0 %v2608_v0  ;;  %v2517_v38 = vld [vmem:[#allocation2 + $0xc0] sm:$0xff]   ;;  %v2520_v40 = vld [vmem:[#allocation2 + $0xd8] sm:$0xff]  }
 0x10b   : > { %v343_v49 = vmax.f32 %v314_v44, 0.0  ;;  %v317_v50 = vadd.f32 %v2749_v36, %v316_v46  ;;  %v2114_v51 = vpop.f32.mrb[3].mxu1  ;;  %v2523_v43 = vld [vmem:[#allocation2 + $0xf0] sm:$0xff]   ;;  %v2790_v44 = vld [vmem:[%s3087_s2 + $0x1] ss:$0 sm:$0xff] }
 0x10c   : > { %v336_v48 = vmax.f32 %v285_v42, 0.0  ;;  %v2522_v42 = vld [vmem:[#allocation2 + $0xe8] sm:$0xff]  }
 0x10d   : > { %v344_v53 = vmax.f32 %v317_v50, 0.0 }
 0x10e   : > { %v348_v52 = vpack.c.bf16 %v336_v48, %v335_v47 }
 0x10f   : > { %v289_v54 = vpop.f32.mrb[4].mxu0  ;;  %v352_v57 = vpack.c.bf16 %v344_v53, %v343_v49 }
 0x110   : > { %v290_v55 = vadd.f32 %v2749_v36, %v289_v54  ;;  %v2101_v56 = vpop.f32.mrb[5].mxu0  ;;  %2140 = vmatmul.mubr.bf16.vlgmr.msra.gmra.mrb[12].mxu1 %v348_v52  ;;  %v321_v59 = vpop.f32.mrb[4].mxu1 }
 0x111   : > { %v292_v58 = vpop.f32.mrb[6].mxu0  ;;  %2143 = vmatprep.mubr.msk.bf16.mxu1 %vm2609_vm0, %v2608_v0  ;;  %v322_v62 = vadd.f32 %v2749_v36, %v321_v59  ;;  %v2117_v63 = vpop.f32.mrb[5].mxu1  ;;  %2212 = vmatpush3.bf16.msra.mxu1 %v2517_v38 }
 0x112   : > { %v293_v60 = vadd.f32 %v2749_v36, %v292_v58  ;;  %v2102_v61 = vpop.f32.mrb[7].mxu0  ;;  %v324_v1 = vpop.f32.mrb[6].mxu1  ;;  %v337_v2 = vmax.f32 %v290_v55, 0.0  ;;  %2213 = vmatprep.subr.bf16.mxu1 %v2608_v0 }
 0x113   : > { %v345_v4 = vmax.f32 %v322_v62, 0.0  ;;  %v325_v5 = vadd.f32 %v2749_v36, %v324_v1  ;;  %v2118_v6 = vpop.f32.mrb[7].mxu1 }
 0x114   : > { %v338_v3 = vmax.f32 %v293_v60, 0.0 }
 0x115   : > { %v346_v8 = vmax.f32 %v325_v5, 0.0 }
 0x116   : > { %v349_v7 = vpack.c.bf16 %v338_v3, %v337_v2 }
 0x117   : > { %v297_v9 = vpop.f32.mrb[8].mxu0  ;;  %v353_v12 = vpack.c.bf16 %v346_v8, %v345_v4 }
 0x118   : > { %v298_v10 = vadd.f32 %v2749_v36, %v297_v9  ;;  %v2105_v11 = vpop.f32.mrb[9].mxu0  ;;  %2144 = vmatmul.mubr.bf16.gmra.mrb[16].mxu1 %v349_v7  ;;  %v329_v14 = vpop.f32.mrb[8].mxu1 }
 0x119   : > { %v300_v13 = vpop.f32.mrb[10].mxu0  ;;  %2147 = vmatprep.mubr.msk.bf16.mxu1 %vm2609_vm0, %v2608_v0  ;;  %v2121_v17 = vpop.f32.mrb[9].mxu1  ;;  %v330_v32 = vadd.f32 %v2749_v36, %v329_v14 }
 0x11a   : > { %v301_v15 = vadd.f32 %v2749_v36, %v300_v13  ;;  %v2106_v16 = vpop.f32.mrb[11].mxu0  ;;  %v332_v18 = vpop.f32.mrb[10].mxu1  ;;  %v339_v19 = vmax.f32 %v298_v10, 0.0 }
 0x11b   : > { %v2122_v21 = vpop.f32.mrb[11].mxu1  ;;  %v347_v33 = vmax.f32 %v330_v32, 0.0 }
 0x11c   : > { %v340_v20 = vmax.f32 %v301_v15, 0.0 }
 0x11d   : > { %v354_v34 = vpack.c.bf16 %v347_v33, %v347_v33 }
 0x11e   : > { %v350_v22 = vpack.c.bf16 %v340_v20, %v339_v19 }
 0x11f   : > { %v305_v23 = vpop.f32.mrb[12].mxu0 }
 0x120   : > { %v306_v24 = vadd.f32 %v2749_v36, %v305_v23  ;;  %v2109_v25 = vpop.f32.mrb[13].mxu0  ;;  %2148 = vmatmul.mubr.bf16.gmra.mrb[20].mxu1 %v350_v22 }
 0x121   : > { %v308_v26 = vpop.f32.mrb[14].mxu0  ;;  %2151 = vmatprep.mubr.msk.bf16.mxu1 %vm2609_vm0, %v2608_v0 }
 0x122   : > { %v309_v27 = vadd.f32 %v2749_v36, %v308_v26  ;;  %v2110_v28 = vpop.f32.mrb[15].mxu0  ;;  %v341_v29 = vmax.f32 %v306_v24, 0.0  ;;  %v2518_v36 = vld [vmem:[#allocation2 + $0xc8] sm:$0xff]  }
 0x123   : > { %2214 = vmatpush3.bf16.msra.mxu1 %v2518_v36 }
 0x124   : > { %v342_v30 = vmax.f32 %v309_v27, 0.0  ;;  %2215 = vmatprep.subr.bf16.mxu1 %v2608_v0 }
 0x126   : > { %v351_v31 = vpack.c.bf16 %v342_v30, %v341_v29 }
 0x127   : > { %2216 = vmatpush3.bf16.msra.mxu1 %v2519_v39 }
 0x128   : > { %2152 = vmatmul.mubr.bf16.gmra.mrb[24].mxu1 %v351_v31  ;;  %2217 = vmatprep.subr.bf16.mxu1 %v2608_v0 }
 0x129   : > { %2155 = vmatprep.mubr.msk.bf16.mxu1 %vm2609_vm0, %v2608_v0 }
 0x12b   : > { %2218 = vmatpush3.bf16.msra.mxu1 %v2520_v40 }
 0x12c   : > { %2219 = vmatprep.subr.bf16.mxu1 %v2608_v0 }
 0x12f   : > { %2220 = vmatpush3.bf16.msra.mxu1 %v2521_v41 }
 0x130   : > { %2156 = vmatmul.mubr.bf16.gmra.mrb[28].mxu1 %v352_v57  ;;  %2221 = vmatprep.subr.bf16.mxu1 %v2608_v0 }
 0x131   : > { %2159 = vmatprep.mubr.msk.bf16.mxu1 %vm2609_vm0, %v2608_v0 }
 0x133   : > { %2222 = vmatpush3.bf16.msra.mxu1 %v2522_v42 }
 0x134   : > { %2223 = vmatprep.subr.bf16.mxu1 %v2608_v0 }
 0x137   : > { %2224 = vmatpush3.bf16.msra.mxu1 %v2523_v43  ;;  %v2524_v43 = vld [vmem:[#allocation2 + $0xf8] sm:$0xff]  }
 0x138   : > { %2160 = vmatmul.mubr.bf16.gmra.mrb[32].mxu1 %v353_v12  ;;  %2225 = vmatprep.subr.bf16.mxu1 %v2608_v0 }
 0x139   : > { %2163 = vmatprep.mubr.msk.bf16.mxu1 %vm2609_vm0, %v2608_v0 }
 0x13b   : > { %2226 = vmatpush3.bf16.msra.mxu1 %v2524_v43 }
 0x13c   : > { %2299 = vmatprep.subr.bf16.mxu1 %v2608_v0 }
 0x140   : > { %2164 = vmatmul.mubr.bf16.gmra.mrb[36].mxu1 %v354_v34 }
 0x141   : > { %2227 = vmatprep.mubr.msk.bf16.mxu1 %vm2609_vm0, %v2608_v0 }
 0x1e3   : > { %v462_v45 = vpop.f32.mrb[12].mxu1 }
 0x1e4   : > { %v463_v46 = vadd.f32 %v2790_v44, %v462_v45  ;;  %v2141_v47 = vpop.f32.mrb[13].mxu1  ;;  %v2525_v45 = vld [vmem:[#allocation2 + $0x100] sm:$0xff]  }
 0x1e5   : > { %v465_v48 = vpop.f32.mrb[14].mxu1  ;;  %v2528_v47 = vld [vmem:[#allocation2 + $0x118] sm:$0xff]  }
 0x1e6   : > { %v466_v49 = vadd.f32 %v2790_v44, %v465_v48  ;;  %v2142_v50 = vpop.f32.mrb[15].mxu1  ;;  %v516_v51 = vmax.f32 %v463_v46, 0.0  ;;  %v2526_v46 = vld [vmem:[#allocation2 + $0x108] sm:$0xff]   ;;  %v2529_v48 = vld [vmem:[#allocation2 + $0x120] sm:$0xff]  }
 0x1e7   : > { %v2531_v50 = vld [vmem:[#allocation2 + $0x130] sm:$0xff]  }
 0x1e8   : > { %v517_v52 = vmax.f32 %v466_v49, 0.0  ;;  %v2530_v49 = vld [vmem:[#allocation2 + $0x128] sm:$0xff]  }
 0x1ea   : > { %v529_v53 = vpack.c.bf16 %v517_v52, %v516_v51  ;;  %v2830_v51 = vld [vmem:[%s3087_s2 + $0x2] ss:$0 sm:$0xff] }
 0x1eb   : > { %v470_v54 = vpop.f32.mrb[16].mxu1 }
 0x1ec   : > { %v471_v55 = vadd.f32 %v2790_v44, %v470_v54  ;;  %v2145_v56 = vpop.f32.mrb[17].mxu1  ;;  %2184 = vmatmul.mubr.bf16.vlgmr.msra.gmra.mrb[16].mxu0 %v529_v53 }
 0x1ed   : > { %v473_v57 = vpop.f32.mrb[18].mxu1  ;;  %2187 = vmatprep.mubr.msk.bf16.mxu0 %vm2609_vm0, %v2608_v0  ;;  %2256 = vmatpush3.bf16.msra.mxu0 %v2525_v45 }
 0x1ee   : > { %v474_v58 = vadd.f32 %v2790_v44, %v473_v57  ;;  %v2146_v59 = vpop.f32.mrb[19].mxu1  ;;  %v518_v60 = vmax.f32 %v471_v55, 0.0  ;;  %2257 = vmatprep.subr.bf16.mxu0 %v2608_v0 }
 0x1f0   : > { %v519_v61 = vmax.f32 %v474_v58, 0.0 }
 0x1f1   : > { %2258 = vmatpush3.bf16.msra.mxu0 %v2526_v46 }
 0x1f2   : > { %v530_v62 = vpack.c.bf16 %v519_v61, %v518_v60  ;;  %2259 = vmatprep.subr.bf16.mxu0 %v2608_v0 }
 0x1f3   : > { %v478_v63 = vpop.f32.mrb[20].mxu1 }
 0x1f4   : > { %v479_v1 = vadd.f32 %v2790_v44, %v478_v63  ;;  %v2149_v2 = vpop.f32.mrb[21].mxu1  ;;  %2188 = vmatmul.mubr.bf16.gmra.mrb[20].mxu0 %v530_v62 }
 0x1f5   : > { %v481_v3 = vpop.f32.mrb[22].mxu1  ;;  %2191 = vmatprep.mubr.msk.bf16.mxu0 %vm2609_vm0, %v2608_v0 }
 0x1f6   : > { %v482_v4 = vadd.f32 %v2790_v44, %v481_v3  ;;  %v2150_v5 = vpop.f32.mrb[23].mxu1  ;;  %v520_v6 = vmax.f32 %v479_v1, 0.0 }
 0x1f8   : > { %v521_v7 = vmax.f32 %v482_v4, 0.0 }
 0x1fa   : > { %v531_v8 = vpack.c.bf16 %v521_v7, %v520_v6 }
 0x1fb   : > { %v486_v9 = vpop.f32.mrb[24].mxu1 }
 0x1fc   : > { %v487_v10 = vadd.f32 %v2790_v44, %v486_v9  ;;  %v2153_v11 = vpop.f32.mrb[25].mxu1  ;;  %2192 = vmatmul.mubr.bf16.gmra.mrb[24].mxu0 %v531_v8 }
 0x1fd   : > { %v489_v12 = vpop.f32.mrb[26].mxu1  ;;  %2195 = vmatprep.mubr.msk.bf16.mxu0 %vm2609_vm0, %v2608_v0 }
 0x1fe   : > { %v490_v13 = vadd.f32 %v2790_v44, %v489_v12  ;;  %v2154_v14 = vpop.f32.mrb[27].mxu1  ;;  %v522_v15 = vmax.f32 %v487_v10, 0.0 }
 0x200   : > { %v523_v16 = vmax.f32 %v490_v13, 0.0 }
 0x202   : > { %v532_v17 = vpack.c.bf16 %v523_v16, %v522_v15 }
 0x203   : > { %v494_v18 = vpop.f32.mrb[28].mxu1 }
 0x204   : > { %v495_v19 = vadd.f32 %v2790_v44, %v494_v18  ;;  %v2157_v20 = vpop.f32.mrb[29].mxu1  ;;  %2196 = vmatmul.mubr.bf16.gmra.mrb[28].mxu0 %v532_v17 }
 0x205   : > { %v497_v21 = vpop.f32.mrb[30].mxu1  ;;  %2199 = vmatprep.mubr.msk.bf16.mxu0 %vm2609_vm0, %v2608_v0 }
 0x206   : > { %v498_v22 = vadd.f32 %v2790_v44, %v497_v21  ;;  %v2158_v23 = vpop.f32.mrb[31].mxu1  ;;  %v524_v24 = vmax.f32 %v495_v19, 0.0 }
 0x208   : > { %v525_v25 = vmax.f32 %v498_v22, 0.0 }
 0x20a   : > { %v533_v26 = vpack.c.bf16 %v525_v25, %v524_v24 }
 0x20b   : > { %v502_v27 = vpop.f32.mrb[32].mxu1 }
 0x20c   : > { %v503_v28 = vadd.f32 %v2790_v44, %v502_v27  ;;  %v2161_v29 = vpop.f32.mrb[33].mxu1  ;;  %2200 = vmatmul.mubr.bf16.gmra.mrb[32].mxu0 %v533_v26 }
 0x20d   : > { %v505_v30 = vpop.f32.mrb[34].mxu1  ;;  %2203 = vmatprep.mubr.msk.bf16.mxu0 %vm2609_vm0, %v2608_v0 }
 0x20e   : > { %v506_v31 = vadd.f32 %v2790_v44, %v505_v30  ;;  %v2162_v32 = vpop.f32.mrb[35].mxu1  ;;  %v526_v33 = vmax.f32 %v503_v28, 0.0 }
 0x210   : > { %v527_v34 = vmax.f32 %v506_v31, 0.0 }
 0x212   : > { %v534_v35 = vpack.c.bf16 %v527_v34, %v526_v33 }
 0x213   : > { %v510_v37 = vpop.f32.mrb[36].mxu1 }
 0x214   : > { %2204 = vmatmul.mubr.bf16.gmra.mrb[36].mxu0 %v534_v35  ;;  %v511_v38 = vadd.f32 %v2790_v44, %v510_v37  ;;  %v2165_v36 = vpop.f32.mrb[37].mxu1  ;;  %v2527_v44 = vld [vmem:[#allocation2 + $0x110] sm:$0xff]  }
 0x215   : > { %v513_v39 = vpop.f32.mrb[38].mxu1  ;;  %2207 = vmatprep.mubr.msk.bf16.mxu0 %vm2609_vm0, %v2608_v0  ;;  %2260 = vmatpush3.bf16.msra.mxu0 %v2527_v44 }
 0x216   : > { %v528_v40 = vmax.f32 %v511_v38, 0.0  ;;  %v2166_v41 = vpop.f32.mrb[39].mxu1  ;;  %2261 = vmatprep.subr.bf16.mxu0 %v2608_v0 }
 0x218   : > { %v535_v42 = vpack.c.bf16 %v528_v40, %v528_v40 }
 0x219   : > { %2262 = vmatpush3.bf16.msra.mxu0 %v2528_v47 }
 0x21a   : > { %2263 = vmatprep.subr.bf16.mxu0 %v2608_v0 }
 0x21c   : > { %2208 = vmatmul.mubr.bf16.gmra.mrb[40].mxu0 %v535_v42 }
 0x21d   : > { %2271 = vmatprep.mubr.msk.bf16.mxu0 %vm2609_vm0, %v2608_v0  ;;  %2264 = vmatpush3.bf16.msra.mxu0 %v2529_v48 }
 0x21e   : > { %2265 = vmatprep.subr.bf16.mxu0 %v2608_v0 }
 0x221   : > { %2266 = vmatpush3.bf16.msra.mxu0 %v2530_v49 }
 0x222   : > { %2267 = vmatprep.subr.bf16.mxu0 %v2608_v0 }
 0x225   : > { %2268 = vmatpush3.bf16.msra.mxu0 %v2531_v50  ;;  %v2532_v50 = vld [vmem:[#allocation2 + $0x138] sm:$0xff]  }
 0x226   : > { %2269 = vmatprep.subr.bf16.mxu0 %v2608_v0 }
 0x229   : > { %2270 = vmatpush3.bf16.msra.mxu0 %v2532_v50 }
 0x22a   : > { %2343 = vmatprep.subr.bf16.mxu0 %v2608_v0 }
 0x2bf   : > { %v643_v52 = vpop.f32.mrb[16].mxu0 }
 0x2c0   : > { %v644_v53 = vadd.f32 %v2830_v51, %v643_v52  ;;  %v2185_v54 = vpop.f32.mrb[17].mxu0  ;;  %v2533_v52 = vld [vmem:[#allocation2 + $0x140] sm:$0xff]  }
 0x2c1   : > { %v646_v55 = vpop.f32.mrb[18].mxu0  ;;  %v2536_v54 = vld [vmem:[#allocation2 + $0x158] sm:$0xff]  }
 0x2c2   : > { %v647_v56 = vadd.f32 %v2830_v51, %v646_v55  ;;  %v2186_v57 = vpop.f32.mrb[19].mxu0  ;;  %v697_v58 = vmax.f32 %v644_v53, 0.0  ;;  %v2534_v53 = vld [vmem:[#allocation2 + $0x148] sm:$0xff]   ;;  %v2537_v55 = vld [vmem:[#allocation2 + $0x160] sm:$0xff]  }
 0x2c3   : > { %v2539_v57 = vld [vmem:[#allocation2 + $0x170] sm:$0xff]  }
 0x2c4   : > { %v698_v59 = vmax.f32 %v647_v56, 0.0  ;;  %v2538_v56 = vld [vmem:[#allocation2 + $0x168] sm:$0xff]  }
 0x2c6   : > { %v710_v60 = vpack.c.bf16 %v698_v59, %v697_v58  ;;  %v2870_v58 = vld [vmem:[%s3087_s2 + $0x3] ss:$0 sm:$0xff] }
 0x2c7   : > { %v651_v61 = vpop.f32.mrb[20].mxu0 }
 0x2c8   : > { %v652_v62 = vadd.f32 %v2830_v51, %v651_v61  ;;  %v2189_v63 = vpop.f32.mrb[21].mxu0  ;;  %2228 = vmatmul.mubr.bf16.vlgmr.msra.gmra.mrb[40].mxu1 %v710_v60 }
 0x2c9   : > { %v654_v1 = vpop.f32.mrb[22].mxu0  ;;  %2231 = vmatprep.mubr.msk.bf16.mxu1 %vm2609_vm0, %v2608_v0  ;;  %2300 = vmatpush3.bf16.msra.mxu1 %v2533_v52 }
 0x2ca   : > { %v655_v2 = vadd.f32 %v2830_v51, %v654_v1  ;;  %v2190_v3 = vpop.f32.mrb[23].mxu0  ;;  %v699_v4 = vmax.f32 %v652_v62, 0.0  ;;  %2301 = vmatprep.subr.bf16.mxu1 %v2608_v0 }
 0x2cc   : > { %v700_v5 = vmax.f32 %v655_v2, 0.0 }
 0x2cd   : > { %2302 = vmatpush3.bf16.msra.mxu1 %v2534_v53 }
 0x2ce   : > { %v711_v6 = vpack.c.bf16 %v700_v5, %v699_v4  ;;  %2303 = vmatprep.subr.bf16.mxu1 %v2608_v0 }
 0x2cf   : > { %v659_v7 = vpop.f32.mrb[24].mxu0 }
 0x2d0   : > { %v660_v8 = vadd.f32 %v2830_v51, %v659_v7  ;;  %v2193_v9 = vpop.f32.mrb[25].mxu0  ;;  %2232 = vmatmul.mubr.bf16.gmra.mrb[44].mxu1 %v711_v6 }
 0x2d1   : > { %v662_v10 = vpop.f32.mrb[26].mxu0  ;;  %2235 = vmatprep.mubr.msk.bf16.mxu1 %vm2609_vm0, %v2608_v0 }
 0x2d2   : > { %v663_v11 = vadd.f32 %v2830_v51, %v662_v10  ;;  %v2194_v12 = vpop.f32.mrb[27].mxu0  ;;  %v701_v13 = vmax.f32 %v660_v8, 0.0 }
 0x2d4   : > { %v702_v14 = vmax.f32 %v663_v11, 0.0 }
 0x2d6   : > { %v712_v15 = vpack.c.bf16 %v702_v14, %v701_v13 }
 0x2d7   : > { %v667_v16 = vpop.f32.mrb[28].mxu0 }
 0x2d8   : > { %v668_v17 = vadd.f32 %v2830_v51, %v667_v16  ;;  %v2197_v18 = vpop.f32.mrb[29].mxu0  ;;  %2236 = vmatmul.mubr.bf16.gmra.mrb[48].mxu1 %v712_v15 }
 0x2d9   : > { %v670_v19 = vpop.f32.mrb[30].mxu0  ;;  %2239 = vmatprep.mubr.msk.bf16.mxu1 %vm2609_vm0, %v2608_v0 }
 0x2da   : > { %v671_v20 = vadd.f32 %v2830_v51, %v670_v19  ;;  %v2198_v21 = vpop.f32.mrb[31].mxu0  ;;  %v703_v22 = vmax.f32 %v668_v17, 0.0 }
 0x2dc   : > { %v704_v23 = vmax.f32 %v671_v20, 0.0 }
 0x2de   : > { %v713_v24 = vpack.c.bf16 %v704_v23, %v703_v22 }
 0x2df   : > { %v675_v25 = vpop.f32.mrb[32].mxu0 }
 0x2e0   : > { %v676_v26 = vadd.f32 %v2830_v51, %v675_v25  ;;  %v2201_v27 = vpop.f32.mrb[33].mxu0  ;;  %2240 = vmatmul.mubr.bf16.gmra.mrb[52].mxu1 %v713_v24 }
 0x2e1   : > { %v678_v28 = vpop.f32.mrb[34].mxu0  ;;  %2243 = vmatprep.mubr.msk.bf16.mxu1 %vm2609_vm0, %v2608_v0 }
 0x2e2   : > { %v679_v29 = vadd.f32 %v2830_v51, %v678_v28  ;;  %v2202_v30 = vpop.f32.mrb[35].mxu0  ;;  %v705_v31 = vmax.f32 %v676_v26, 0.0 }
 0x2e4   : > { %v706_v32 = vmax.f32 %v679_v29, 0.0 }
 0x2e6   : > { %v714_v33 = vpack.c.bf16 %v706_v32, %v705_v31 }
 0x2e7   : > { %v683_v34 = vpop.f32.mrb[36].mxu0 }
 0x2e8   : > { %v684_v35 = vadd.f32 %v2830_v51, %v683_v34  ;;  %v2205_v37 = vpop.f32.mrb[37].mxu0  ;;  %2244 = vmatmul.mubr.bf16.gmra.mrb[56].mxu1 %v714_v33 }
 0x2e9   : > { %v686_v38 = vpop.f32.mrb[38].mxu0  ;;  %2247 = vmatprep.mubr.msk.bf16.mxu1 %vm2609_vm0, %v2608_v0 }
 0x2ea   : > { %v687_v36 = vadd.f32 %v2830_v51, %v686_v38  ;;  %v2206_v39 = vpop.f32.mrb[39].mxu0  ;;  %v707_v40 = vmax.f32 %v684_v35, 0.0 }
 0x2ec   : > { %v708_v41 = vmax.f32 %v687_v36, 0.0 }
 0x2ee   : > { %v715_v42 = vpack.c.bf16 %v708_v41, %v707_v40 }
 0x2ef   : > { %v691_v43 = vpop.f32.mrb[40].mxu0 }
 0x2f0   : > { %2248 = vmatmul.mubr.bf16.gmra.mrb[60].mxu1 %v715_v42  ;;  %v692_v45 = vadd.f32 %v2830_v51, %v691_v43  ;;  %v2209_v46 = vpop.f32.mrb[41].mxu0  ;;  %v2535_v51 = vld [vmem:[#allocation2 + $0x150] sm:$0xff]  }
 0x2f1   : > { %v694_v44 = vpop.f32.mrb[42].mxu0  ;;  %2251 = vmatprep.mubr.msk.bf16.mxu1 %vm2609_vm0, %v2608_v0  ;;  %2304 = vmatpush3.bf16.msra.mxu1 %v2535_v51 }
 0x2f2   : > { %v709_v47 = vmax.f32 %v692_v45, 0.0  ;;  %v2210_v48 = vpop.f32.mrb[43].mxu0  ;;  %2305 = vmatprep.subr.bf16.mxu1 %v2608_v0 }
 0x2f4   : > { %v716_v49 = vpack.c.bf16 %v709_v47, %v709_v47 }
 0x2f5   : > { %2306 = vmatpush3.bf16.msra.mxu1 %v2536_v54 }
 0x2f6   : > { %2307 = vmatprep.subr.bf16.mxu1 %v2608_v0 }
 0x2f8   : > { %2252 = vmatmul.mubr.bf16.gmra.mrb[64].mxu1 %v716_v49 }
 0x2f9   : > { %2315 = vmatprep.mubr.msk.bf16.mxu1 %vm2609_vm0, %v2608_v0  ;;  %2308 = vmatpush3.bf16.msra.mxu1 %v2537_v55 }
 0x2fa   : > { %2309 = vmatprep.subr.bf16.mxu1 %v2608_v0 }
 0x2fd   : > { %2310 = vmatpush3.bf16.msra.mxu1 %v2538_v56 }
 0x2fe   : > { %2311 = vmatprep.subr.bf16.mxu1 %v2608_v0 }
 0x301   : > { %2312 = vmatpush3.bf16.msra.mxu1 %v2539_v57  ;;  %v2540_v57 = vld [vmem:[#allocation2 + $0x178] sm:$0xff]  }
 0x302   : > { %2313 = vmatprep.subr.bf16.mxu1 %v2608_v0 }
 0x305   : > { %2314 = vmatpush3.bf16.msra.mxu1 %v2540_v57 }
 0x306   : > { %2387 = vmatprep.subr.bf16.mxu1 %v2608_v0 }
 0x39b   : > { %v824_v59 = vpop.f32.mrb[40].mxu1 }
 0x39c   : > { %v825_v60 = vadd.f32 %v2870_v58, %v824_v59  ;;  %v2229_v61 = vpop.f32.mrb[41].mxu1  ;;  %v2541_v59 = vld [vmem:[#allocation2 + $0x180] sm:$0xff]  }
 0x39d   : > { %v827_v62 = vpop.f32.mrb[42].mxu1  ;;  %v2544_v61 = vld [vmem:[#allocation2 + $0x198] sm:$0xff]  }
 0x39e   : > { %v828_v63 = vadd.f32 %v2870_v58, %v827_v62  ;;  %v2230_v1 = vpop.f32.mrb[43].mxu1  ;;  %v878_v2 = vmax.f32 %v825_v60, 0.0  ;;  %v2542_v60 = vld [vmem:[#allocation2 + $0x188] sm:$0xff]   ;;  %v2545_v62 = vld [vmem:[#allocation2 + $0x1a0] sm:$0xff]  }
 0x39f   : > { %v2547_v1 = vld [vmem:[#allocation2 + $0x1b0] sm:$0xff]  }
 0x3a0   : > { %v879_v3 = vmax.f32 %v828_v63, 0.0  ;;  %v2546_v63 = vld [vmem:[#allocation2 + $0x1a8] sm:$0xff]  }
 0x3a2   : > { %v891_v4 = vpack.c.bf16 %v879_v3, %v878_v2  ;;  %v2910_v2 = vld [vmem:[%s3087_s2 + $0x4] ss:$0 sm:$0xff] }
 0x3a3   : > { %v832_v5 = vpop.f32.mrb[44].mxu1 }
 0x3a4   : > { %v833_v6 = vadd.f32 %v2870_v58, %v832_v5  ;;  %v2233_v7 = vpop.f32.mrb[45].mxu1  ;;  %2272 = vmatmul.mubr.bf16.vlgmr.msra.gmra.mrb[44].mxu0 %v891_v4 }
 0x3a5   : > { %v835_v8 = vpop.f32.mrb[46].mxu1  ;;  %2275 = vmatprep.mubr.msk.bf16.mxu0 %vm2609_vm0, %v2608_v0  ;;  %2344 = vmatpush3.bf16.msra.mxu0 %v2541_v59 }
 0x3a6   : > { %v836_v9 = vadd.f32 %v2870_v58, %v835_v8  ;;  %v2234_v10 = vpop.f32.mrb[47].mxu1  ;;  %v880_v11 = vmax.f32 %v833_v6, 0.0  ;;  %2345 = vmatprep.subr.bf16.mxu0 %v2608_v0 }
 0x3a8   : > { %v881_v12 = vmax.f32 %v836_v9, 0.0 }
 0x3a9   : > { %2346 = vmatpush3.bf16.msra.mxu0 %v2542_v60 }
 0x3aa   : > { %v892_v13 = vpack.c.bf16 %v881_v12, %v880_v11  ;;  %2347 = vmatprep.subr.bf16.mxu0 %v2608_v0 }
 0x3ab   : > { %v840_v14 = vpop.f32.mrb[48].mxu1 }
 0x3ac   : > { %v841_v15 = vadd.f32 %v2870_v58, %v840_v14  ;;  %v2237_v16 = vpop.f32.mrb[49].mxu1  ;;  %2276 = vmatmul.mubr.bf16.gmra.mrb[48].mxu0 %v892_v13 }
 0x3ad   : > { %v843_v17 = vpop.f32.mrb[50].mxu1  ;;  %2279 = vmatprep.mubr.msk.bf16.mxu0 %vm2609_vm0, %v2608_v0 }
 0x3ae   : > { %v844_v18 = vadd.f32 %v2870_v58, %v843_v17  ;;  %v2238_v19 = vpop.f32.mrb[51].mxu1  ;;  %v882_v20 = vmax.f32 %v841_v15, 0.0 }
 0x3b0   : > { %v883_v21 = vmax.f32 %v844_v18, 0.0 }
 0x3b2   : > { %v893_v22 = vpack.c.bf16 %v883_v21, %v882_v20 }
 0x3b3   : > { %v848_v23 = vpop.f32.mrb[52].mxu1 }
 0x3b4   : > { %v849_v24 = vadd.f32 %v2870_v58, %v848_v23  ;;  %v2241_v25 = vpop.f32.mrb[53].mxu1  ;;  %2280 = vmatmul.mubr.bf16.gmra.mrb[52].mxu0 %v893_v22 }
 0x3b5   : > { %v851_v26 = vpop.f32.mrb[54].mxu1  ;;  %2283 = vmatprep.mubr.msk.bf16.mxu0 %vm2609_vm0, %v2608_v0 }
 0x3b6   : > { %v852_v27 = vadd.f32 %v2870_v58, %v851_v26  ;;  %v2242_v28 = vpop.f32.mrb[55].mxu1  ;;  %v884_v29 = vmax.f32 %v849_v24, 0.0 }
 0x3b8   : > { %v885_v30 = vmax.f32 %v852_v27, 0.0 }
 0x3ba   : > { %v894_v31 = vpack.c.bf16 %v885_v30, %v884_v29 }
 0x3bb   : > { %v856_v32 = vpop.f32.mrb[56].mxu1 }
 0x3bc   : > { %v857_v33 = vadd.f32 %v2870_v58, %v856_v32  ;;  %v2245_v34 = vpop.f32.mrb[57].mxu1  ;;  %2284 = vmatmul.mubr.bf16.gmra.mrb[56].mxu0 %v894_v31 }
 0x3bd   : > { %v859_v35 = vpop.f32.mrb[58].mxu1  ;;  %2287 = vmatprep.mubr.msk.bf16.mxu0 %vm2609_vm0, %v2608_v0 }
 0x3be   : > { %v860_v37 = vadd.f32 %v2870_v58, %v859_v35  ;;  %v2246_v38 = vpop.f32.mrb[59].mxu1  ;;  %v886_v36 = vmax.f32 %v857_v33, 0.0 }
 0x3c0   : > { %v887_v39 = vmax.f32 %v860_v37, 0.0 }
 0x3c2   : > { %v895_v40 = vpack.c.bf16 %v887_v39, %v886_v36 }
 0x3c3   : > { %v864_v41 = vpop.f32.mrb[60].mxu1 }
 0x3c4   : > { %v865_v42 = vadd.f32 %v2870_v58, %v864_v41  ;;  %v2249_v43 = vpop.f32.mrb[61].mxu1  ;;  %2288 = vmatmul.mubr.bf16.gmra.mrb[60].mxu0 %v895_v40 }
 0x3c5   : > { %v867_v45 = vpop.f32.mrb[62].mxu1  ;;  %2291 = vmatprep.mubr.msk.bf16.mxu0 %vm2609_vm0, %v2608_v0 }
 0x3c6   : > { %v868_v46 = vadd.f32 %v2870_v58, %v867_v45  ;;  %v2250_v44 = vpop.f32.mrb[63].mxu1  ;;  %v888_v47 = vmax.f32 %v865_v42, 0.0 }
 0x3c8   : > { %v889_v48 = vmax.f32 %v868_v46, 0.0 }
 0x3ca   : > { %v896_v49 = vpack.c.bf16 %v889_v48, %v888_v47 }
 0x3cb   : > { %v872_v50 = vpop.f32.mrb[64].mxu1 }
 0x3cc   : > { %2292 = vmatmul.mubr.bf16.gmra.mrb[64].mxu0 %v896_v49  ;;  %v873_v52 = vadd.f32 %v2870_v58, %v872_v50  ;;  %v2253_v53 = vpop.f32.mrb[65].mxu1  ;;  %v2543_v58 = vld [vmem:[#allocation2 + $0x190] sm:$0xff]  }
 0x3cd   : > { %v875_v51 = vpop.f32.mrb[66].mxu1  ;;  %2295 = vmatprep.mubr.msk.bf16.mxu0 %vm2609_vm0, %v2608_v0  ;;  %2348 = vmatpush3.bf16.msra.mxu0 %v2543_v58 }
 0x3ce   : > { %v890_v54 = vmax.f32 %v873_v52, 0.0  ;;  %v2254_v55 = vpop.f32.mrb[67].mxu1  ;;  %2349 = vmatprep.subr.bf16.mxu0 %v2608_v0 }
 0x3d0   : > { %v897_v56 = vpack.c.bf16 %v890_v54, %v890_v54 }
 0x3d1   : > { %2350 = vmatpush3.bf16.msra.mxu0 %v2544_v61 }
 0x3d2   : > { %2351 = vmatprep.subr.bf16.mxu0 %v2608_v0 }
 0x3d4   : > { %2296 = vmatmul.mubr.bf16.gmra.mrb[68].mxu0 %v897_v56 }
 0x3d5   : > { %2359 = vmatprep.mubr.msk.bf16.mxu0 %vm2609_vm0, %v2608_v0  ;;  %2352 = vmatpush3.bf16.msra.mxu0 %v2545_v62 }
 0x3d6   : > { %2353 = vmatprep.subr.bf16.mxu0 %v2608_v0 }
 0x3d9   : > { %2354 = vmatpush3.bf16.msra.mxu0 %v2546_v63 }
 0x3da   : > { %2355 = vmatprep.subr.bf16.mxu0 %v2608_v0 }
 0x3dd   : > { %2356 = vmatpush3.bf16.msra.mxu0 %v2547_v1  ;;  %v2548_v1 = vld [vmem:[#allocation2 + $0x1b8] sm:$0xff]  }
 0x3de   : > { %2357 = vmatprep.subr.bf16.mxu0 %v2608_v0 }
 0x3e1   : > { %2358 = vmatpush3.bf16.msra.mxu0 %v2548_v1 }
 0x3e2   : > { %2431 = vmatprep.subr.bf16.mxu0 %v2608_v0 }
 0x477   : > { %v1005_v3 = vpop.f32.mrb[44].mxu0 }
 0x478   : > { %v1006_v4 = vadd.f32 %v2910_v2, %v1005_v3  ;;  %v2273_v5 = vpop.f32.mrb[45].mxu0  ;;  %v2549_v3 = vld [vmem:[#allocation2 + $0x1c0] sm:$0xff]  }
 0x479   : > { %v1008_v6 = vpop.f32.mrb[46].mxu0  ;;  %v2552_v5 = vld [vmem:[#allocation2 + $0x1d8] sm:$0xff]  }
 0x47a   : > { %v1009_v7 = vadd.f32 %v2910_v2, %v1008_v6  ;;  %v2274_v8 = vpop.f32.mrb[47].mxu0  ;;  %v1059_v9 = vmax.f32 %v1006_v4, 0.0  ;;  %v2550_v4 = vld [vmem:[#allocation2 + $0x1c8] sm:$0xff]   ;;  %v2553_v6 = vld [vmem:[#allocation2 + $0x1e0] sm:$0xff]  }
 0x47b   : > { %v2555_v8 = vld [vmem:[#allocation2 + $0x1f0] sm:$0xff]  }
 0x47c   : > { %v1060_v10 = vmax.f32 %v1009_v7, 0.0  ;;  %v2554_v7 = vld [vmem:[#allocation2 + $0x1e8] sm:$0xff]  }
 0x47e   : > { %v1072_v11 = vpack.c.bf16 %v1060_v10, %v1059_v9  ;;  %v2950_v9 = vld [vmem:[%s3087_s2 + $0x5] ss:$0 sm:$0xff] }
 0x47f   : > { %v1013_v12 = vpop.f32.mrb[48].mxu0 }
 0x480   : > { %v1014_v13 = vadd.f32 %v2910_v2, %v1013_v12  ;;  %v2277_v14 = vpop.f32.mrb[49].mxu0  ;;  %2316 = vmatmul.mubr.bf16.vlgmr.msra.gmra.mrb[68].mxu1 %v1072_v11 }
 0x481   : > { %v1016_v15 = vpop.f32.mrb[50].mxu0  ;;  %2319 = vmatprep.mubr.msk.bf16.mxu1 %vm2609_vm0, %v2608_v0  ;;  %2388 = vmatpush3.bf16.msra.mxu1 %v2549_v3 }
 0x482   : > { %v1017_v16 = vadd.f32 %v2910_v2, %v1016_v15  ;;  %v2278_v17 = vpop.f32.mrb[51].mxu0  ;;  %v1061_v18 = vmax.f32 %v1014_v13, 0.0  ;;  %2389 = vmatprep.subr.bf16.mxu1 %v2608_v0 }
 0x484   : > { %v1062_v19 = vmax.f32 %v1017_v16, 0.0 }
 0x485   : > { %2390 = vmatpush3.bf16.msra.mxu1 %v2550_v4 }
 0x486   : > { %v1073_v20 = vpack.c.bf16 %v1062_v19, %v1061_v18  ;;  %2391 = vmatprep.subr.bf16.mxu1 %v2608_v0 }
 0x487   : > { %v1021_v21 = vpop.f32.mrb[52].mxu0 }
 0x488   : > { %v1022_v22 = vadd.f32 %v2910_v2, %v1021_v21  ;;  %v2281_v23 = vpop.f32.mrb[53].mxu0  ;;  %2320 = vmatmul.mubr.bf16.gmra.mrb[72].mxu1 %v1073_v20 }
 0x489   : > { %v1024_v24 = vpop.f32.mrb[54].mxu0  ;;  %2323 = vmatprep.mubr.msk.bf16.mxu1 %vm2609_vm0, %v2608_v0 }
 0x48a   : > { %v1025_v25 = vadd.f32 %v2910_v2, %v1024_v24  ;;  %v2282_v26 = vpop.f32.mrb[55].mxu0  ;;  %v1063_v27 = vmax.f32 %v1022_v22, 0.0 }
 0x48c   : > { %v1064_v28 = vmax.f32 %v1025_v25, 0.0 }
 0x48e   : > { %v1074_v29 = vpack.c.bf16 %v1064_v28, %v1063_v27 }
 0x48f   : > { %v1029_v30 = vpop.f32.mrb[56].mxu0 }
 0x490   : > { %v1030_v31 = vadd.f32 %v2910_v2, %v1029_v30  ;;  %v2285_v32 = vpop.f32.mrb[57].mxu0  ;;  %2324 = vmatmul.mubr.bf16.gmra.mrb[76].mxu1 %v1074_v29 }
 0x491   : > { %v1032_v33 = vpop.f32.mrb[58].mxu0  ;;  %2327 = vmatprep.mubr.msk.bf16.mxu1 %vm2609_vm0, %v2608_v0 }
 0x492   : > { %v1033_v34 = vadd.f32 %v2910_v2, %v1032_v33  ;;  %v2286_v35 = vpop.f32.mrb[59].mxu0  ;;  %v1065_v37 = vmax.f32 %v1030_v31, 0.0 }
 0x494   : > { %v1066_v38 = vmax.f32 %v1033_v34, 0.0 }
 0x496   : > { %v1075_v36 = vpack.c.bf16 %v1066_v38, %v1065_v37 }
 0x497   : > { %v1037_v39 = vpop.f32.mrb[60].mxu0 }
 0x498   : > { %v1038_v40 = vadd.f32 %v2910_v2, %v1037_v39  ;;  %v2289_v41 = vpop.f32.mrb[61].mxu0  ;;  %2328 = vmatmul.mubr.bf16.gmra.mrb[80].mxu1 %v1075_v36 }
 0x499   : > { %v1040_v42 = vpop.f32.mrb[62].mxu0  ;;  %2331 = vmatprep.mubr.msk.bf16.mxu1 %vm2609_vm0, %v2608_v0 }
 0x49a   : > { %v1041_v43 = vadd.f32 %v2910_v2, %v1040_v42  ;;  %v2290_v45 = vpop.f32.mrb[63].mxu0  ;;  %v1067_v46 = vmax.f32 %v1038_v40, 0.0 }
 0x49c   : > { %v1068_v44 = vmax.f32 %v1041_v43, 0.0 }
 0x49e   : > { %v1076_v47 = vpack.c.bf16 %v1068_v44, %v1067_v46 }
 0x49f   : > { %v1045_v48 = vpop.f32.mrb[64].mxu0 }
 0x4a0   : > { %v1046_v49 = vadd.f32 %v2910_v2, %v1045_v48  ;;  %v2293_v50 = vpop.f32.mrb[65].mxu0  ;;  %2332 = vmatmul.mubr.bf16.gmra.mrb[84].mxu1 %v1076_v47 }
 0x4a1   : > { %v1048_v52 = vpop.f32.mrb[66].mxu0  ;;  %2335 = vmatprep.mubr.msk.bf16.mxu1 %vm2609_vm0, %v2608_v0 }
 0x4a2   : > { %v1049_v53 = vadd.f32 %v2910_v2, %v1048_v52  ;;  %v2294_v51 = vpop.f32.mrb[67].mxu0  ;;  %v1069_v54 = vmax.f32 %v1046_v49, 0.0 }
 0x4a4   : > { %v1070_v55 = vmax.f32 %v1049_v53, 0.0 }
 0x4a6   : > { %v1077_v56 = vpack.c.bf16 %v1070_v55, %v1069_v54 }
 0x4a7   : > { %v1053_v57 = vpop.f32.mrb[68].mxu0 }
 0x4a8   : > { %2336 = vmatmul.mubr.bf16.gmra.mrb[88].mxu1 %v1077_v56  ;;  %v1054_v59 = vadd.f32 %v2910_v2, %v1053_v57  ;;  %v2297_v60 = vpop.f32.mrb[69].mxu0  ;;  %v2551_v2 = vld [vmem:[#allocation2 + $0x1d0] sm:$0xff]  }
 0x4a9   : > { %v1056_v58 = vpop.f32.mrb[70].mxu0  ;;  %2339 = vmatprep.mubr.msk.bf16.mxu1 %vm2609_vm0, %v2608_v0  ;;  %2392 = vmatpush3.bf16.msra.mxu1 %v2551_v2 }
 0x4aa   : > { %v1071_v61 = vmax.f32 %v1054_v59, 0.0  ;;  %v2298_v62 = vpop.f32.mrb[71].mxu0  ;;  %2393 = vmatprep.subr.bf16.mxu1 %v2608_v0 }
 0x4ac   : > { %v1078_v63 = vpack.c.bf16 %v1071_v61, %v1071_v61 }
 0x4ad   : > { %2394 = vmatpush3.bf16.msra.mxu1 %v2552_v5 }
 0x4ae   : > { %2395 = vmatprep.subr.bf16.mxu1 %v2608_v0 }
 0x4b0   : > { %2340 = vmatmul.mubr.bf16.gmra.mrb[92].mxu1 %v1078_v63 }
 0x4b1   : > { %2403 = vmatprep.mubr.msk.bf16.mxu1 %vm2609_vm0, %v2608_v0  ;;  %2396 = vmatpush3.bf16.msra.mxu1 %v2553_v6 }
 0x4b2   : > { %2397 = vmatprep.subr.bf16.mxu1 %v2608_v0 }
 0x4b5   : > { %2398 = vmatpush3.bf16.msra.mxu1 %v2554_v7 }
 0x4b6   : > { %2399 = vmatprep.subr.bf16.mxu1 %v2608_v0 }
 0x4b9   : > { %2400 = vmatpush3.bf16.msra.mxu1 %v2555_v8  ;;  %v2556_v8 = vld [vmem:[#allocation2 + $0x1f8] sm:$0xff]  }
 0x4ba   : > { %2401 = vmatprep.subr.bf16.mxu1 %v2608_v0 }
 0x4bd   : > { %2402 = vmatpush3.bf16.msra.mxu1 %v2556_v8 }
 0x553   : > { %v1186_v10 = vpop.f32.mrb[68].mxu1 }
 0x554   : > { %v1187_v11 = vadd.f32 %v2950_v9, %v1186_v10  ;;  %v2317_v12 = vpop.f32.mrb[69].mxu1  ;;  %v2557_v10 = vld [vmem:[#allocation2 + $0x200] sm:$0xff]  }
 0x555   : > { %v1189_v13 = vpop.f32.mrb[70].mxu1  ;;  %v2560_v12 = vld [vmem:[#allocation2 + $0x218] sm:$0xff]  }
 0x556   : > { %v1190_v14 = vadd.f32 %v2950_v9, %v1189_v13  ;;  %v2318_v15 = vpop.f32.mrb[71].mxu1  ;;  %v1240_v16 = vmax.f32 %v1187_v11, 0.0  ;;  %v2558_v11 = vld [vmem:[#allocation2 + $0x208] sm:$0xff]   ;;  %v2561_v13 = vld [vmem:[#allocation2 + $0x220] sm:$0xff]  }
 0x557   : > { %v2563_v15 = vld [vmem:[#allocation2 + $0x230] sm:$0xff]  }
 0x558   : > { %v1241_v17 = vmax.f32 %v1190_v14, 0.0  ;;  %v2562_v14 = vld [vmem:[#allocation2 + $0x228] sm:$0xff]  }
 0x55a   : > { %v1253_v18 = vpack.c.bf16 %v1241_v17, %v1240_v16  ;;  %v2989_v16 = vld [vmem:[%s3087_s2 + $0x6] ss:$0 sm:$0xff] }
 0x55b   : > { %v1194_v19 = vpop.f32.mrb[72].mxu1 }
 0x55c   : > { %v1195_v20 = vadd.f32 %v2950_v9, %v1194_v19  ;;  %v2321_v21 = vpop.f32.mrb[73].mxu1  ;;  %2360 = vmatmul.mubr.bf16.vlgmr.msra.gmra.mrb[72].mxu0 %v1253_v18 }
 0x55d   : > { %v1197_v22 = vpop.f32.mrb[74].mxu1  ;;  %2363 = vmatprep.mubr.msk.bf16.mxu0 %vm2609_vm0, %v2608_v0  ;;  %2432 = vmatpush3.bf16.msra.mxu0 %v2557_v10 }
 0x55e   : > { %v1198_v23 = vadd.f32 %v2950_v9, %v1197_v22  ;;  %v2322_v24 = vpop.f32.mrb[75].mxu1  ;;  %v1242_v25 = vmax.f32 %v1195_v20, 0.0  ;;  %2433 = vmatprep.subr.bf16.mxu0 %v2608_v0 }
 0x560   : > { %v1243_v26 = vmax.f32 %v1198_v23, 0.0 }
 0x561   : > { %2434 = vmatpush3.bf16.msra.mxu0 %v2558_v11 }
 0x562   : > { %v1254_v27 = vpack.c.bf16 %v1243_v26, %v1242_v25  ;;  %2435 = vmatprep.subr.bf16.mxu0 %v2608_v0 }
 0x563   : > { %v1202_v28 = vpop.f32.mrb[76].mxu1 }
 0x564   : > { %v1203_v29 = vadd.f32 %v2950_v9, %v1202_v28  ;;  %v2325_v30 = vpop.f32.mrb[77].mxu1  ;;  %2364 = vmatmul.mubr.bf16.gmra.mrb[76].mxu0 %v1254_v27 }
 0x565   : > { %v1205_v31 = vpop.f32.mrb[78].mxu1  ;;  %2367 = vmatprep.mubr.msk.bf16.mxu0 %vm2609_vm0, %v2608_v0 }
 0x566   : > { %v1206_v32 = vadd.f32 %v2950_v9, %v1205_v31  ;;  %v2326_v33 = vpop.f32.mrb[79].mxu1  ;;  %v1244_v34 = vmax.f32 %v1203_v29, 0.0 }
 0x568   : > { %v1245_v35 = vmax.f32 %v1206_v32, 0.0 }
 0x56a   : > { %v1255_v37 = vpack.c.bf16 %v1245_v35, %v1244_v34 }
 0x56b   : > { %v1210_v38 = vpop.f32.mrb[80].mxu1 }
 0x56c   : > { %v1211_v36 = vadd.f32 %v2950_v9, %v1210_v38  ;;  %v2329_v39 = vpop.f32.mrb[81].mxu1  ;;  %2368 = vmatmul.mubr.bf16.gmra.mrb[80].mxu0 %v1255_v37 }
 0x56d   : > { %v1213_v40 = vpop.f32.mrb[82].mxu1  ;;  %2371 = vmatprep.mubr.msk.bf16.mxu0 %vm2609_vm0, %v2608_v0 }
 0x56e   : > { %v1214_v41 = vadd.f32 %v2950_v9, %v1213_v40  ;;  %v2330_v42 = vpop.f32.mrb[83].mxu1  ;;  %v1246_v43 = vmax.f32 %v1211_v36, 0.0 }
 0x570   : > { %v1247_v45 = vmax.f32 %v1214_v41, 0.0 }
 0x572   : > { %v1256_v46 = vpack.c.bf16 %v1247_v45, %v1246_v43 }
 0x573   : > { %v1218_v44 = vpop.f32.mrb[84].mxu1 }
 0x574   : > { %v1219_v47 = vadd.f32 %v2950_v9, %v1218_v44  ;;  %v2333_v48 = vpop.f32.mrb[85].mxu1  ;;  %2372 = vmatmul.mubr.bf16.gmra.mrb[84].mxu0 %v1256_v46 }
 0x575   : > { %v1221_v49 = vpop.f32.mrb[86].mxu1  ;;  %2375 = vmatprep.mubr.msk.bf16.mxu0 %vm2609_vm0, %v2608_v0 }
 0x576   : > { %v1222_v50 = vadd.f32 %v2950_v9, %v1221_v49  ;;  %v2334_v52 = vpop.f32.mrb[87].mxu1  ;;  %v1248_v53 = vmax.f32 %v1219_v47, 0.0 }
 0x578   : > { %v1249_v51 = vmax.f32 %v1222_v50, 0.0 }
 0x57a   : > { %v1257_v54 = vpack.c.bf16 %v1249_v51, %v1248_v53 }
 0x57b   : > { %v1226_v55 = vpop.f32.mrb[88].mxu1 }
 0x57c   : > { %v1227_v56 = vadd.f32 %v2950_v9, %v1226_v55  ;;  %v2337_v57 = vpop.f32.mrb[89].mxu1  ;;  %2376 = vmatmul.mubr.bf16.gmra.mrb[88].mxu0 %v1257_v54 }
 0x57d   : > { %v1229_v59 = vpop.f32.mrb[90].mxu1  ;;  %2379 = vmatprep.mubr.msk.bf16.mxu0 %vm2609_vm0, %v2608_v0 }
 0x57e   : > { %v1230_v60 = vadd.f32 %v2950_v9, %v1229_v59  ;;  %v2338_v58 = vpop.f32.mrb[91].mxu1  ;;  %v1250_v61 = vmax.f32 %v1227_v56, 0.0 }
 0x580   : > { %v1251_v62 = vmax.f32 %v1230_v60, 0.0 }
 0x582   : > { %v1258_v63 = vpack.c.bf16 %v1251_v62, %v1250_v61 }
 0x583   : > { %v1234_v1 = vpop.f32.mrb[92].mxu1 }
 0x584   : > { %2380 = vmatmul.mubr.bf16.gmra.mrb[92].mxu0 %v1258_v63  ;;  %v1235_v3 = vadd.f32 %v2950_v9, %v1234_v1  ;;  %v2341_v4 = vpop.f32.mrb[93].mxu1  ;;  %v2559_v9 = vld [vmem:[#allocation2 + $0x210] sm:$0xff]  }
 0x585   : > { %v1237_v2 = vpop.f32.mrb[94].mxu1  ;;  %2383 = vmatprep.mubr.msk.bf16.mxu0 %vm2609_vm0, %v2608_v0  ;;  %2436 = vmatpush3.bf16.msra.mxu0 %v2559_v9 }
 0x586   : > { %v1252_v5 = vmax.f32 %v1235_v3, 0.0  ;;  %v2342_v6 = vpop.f32.mrb[95].mxu1  ;;  %2437 = vmatprep.subr.bf16.mxu0 %v2608_v0 }
 0x588   : > { %v1259_v7 = vpack.c.bf16 %v1252_v5, %v1252_v5 }
 0x589   : > { %2438 = vmatpush3.bf16.msra.mxu0 %v2560_v12 }
 0x58a   : > { %2439 = vmatprep.subr.bf16.mxu0 %v2608_v0 }
 0x58c   : > { %2384 = vmatmul.mubr.bf16.gmra.mrb[96].mxu0 %v1259_v7 }
 0x58d   : > { %2447 = vmatprep.mubr.msk.bf16.mxu0 %vm2609_vm0, %v2608_v0  ;;  %2440 = vmatpush3.bf16.msra.mxu0 %v2561_v13 }
 0x58e   : > { %2441 = vmatprep.subr.bf16.mxu0 %v2608_v0 }
 0x591   : > { %2442 = vmatpush3.bf16.msra.mxu0 %v2562_v14 }
 0x592   : > { %2443 = vmatprep.subr.bf16.mxu0 %v2608_v0 }
 0x595   : > { %2444 = vmatpush3.bf16.msra.mxu0 %v2563_v15  ;;  %v2564_v15 = vld [vmem:[#allocation2 + $0x238] sm:$0xff]  }
 0x596   : > { %2445 = vmatprep.subr.bf16.mxu0 %v2608_v0 }
 0x599   : > { %2446 = vmatpush3.bf16.msra.mxu0 %v2564_v15  ;;  %v1954_v15 = vld [vmem:[%s3087_s2 + $0x8] ss:$0 sm:$0xff] }
 0x62f   : > { %v1367_v17 = vpop.f32.mrb[72].mxu0 }
 0x630   : > { %v1368_v18 = vadd.f32 %v2989_v16, %v1367_v17  ;;  %v2361_v19 = vpop.f32.mrb[73].mxu0  ;;  %v3019_v17 = vld [vmem:[%s3087_s2 + $0x7] ss:$0 sm:$0xff] }
 0x631   : > { %v1370_v20 = vpop.f32.mrb[74].mxu0 }
 0x632   : > { %v1371_v21 = vadd.f32 %v2989_v16, %v1370_v20  ;;  %v2362_v22 = vpop.f32.mrb[75].mxu0  ;;  %v1421_v23 = vmax.f32 %v1368_v18, 0.0 }
 0x634   : > { %v1422_v24 = vmax.f32 %v1371_v21, 0.0 }
 0x636   : > { %v1434_v25 = vpack.c.bf16 %v1422_v24, %v1421_v23 }
 0x637   : > { %v1375_v26 = vpop.f32.mrb[76].mxu0 }
 0x638   : > { %v1376_v27 = vadd.f32 %v2989_v16, %v1375_v26  ;;  %v2365_v28 = vpop.f32.mrb[77].mxu0  ;;  %2404 = vmatmul.mubr.bf16.vlgmr.msra.gmra.mrb[96].mxu1 %v1434_v25 }
 0x639   : > { %v1378_v29 = vpop.f32.mrb[78].mxu0  ;;  %2407 = vmatprep.mubr.msk.bf16.mxu1 %vm2609_vm0, %v2608_v0 }
 0x63a   : > { %v1379_v30 = vadd.f32 %v2989_v16, %v1378_v29  ;;  %v2366_v31 = vpop.f32.mrb[79].mxu0  ;;  %v1423_v32 = vmax.f32 %v1376_v27, 0.0 }
 0x63c   : > { %v1424_v33 = vmax.f32 %v1379_v30, 0.0 }
 0x63e   : > { %v1435_v34 = vpack.c.bf16 %v1424_v33, %v1423_v32 }
 0x63f   : > { %v1383_v35 = vpop.f32.mrb[80].mxu0 }
 0x640   : > { %v1384_v37 = vadd.f32 %v2989_v16, %v1383_v35  ;;  %v2369_v38 = vpop.f32.mrb[81].mxu0  ;;  %2408 = vmatmul.mubr.bf16.gmra.mrb[100].mxu1 %v1435_v34 }
 0x641   : > { %v1386_v36 = vpop.f32.mrb[82].mxu0  ;;  %2411 = vmatprep.mubr.msk.bf16.mxu1 %vm2609_vm0, %v2608_v0 }
 0x642   : > { %v1387_v39 = vadd.f32 %v2989_v16, %v1386_v36  ;;  %v2370_v40 = vpop.f32.mrb[83].mxu0  ;;  %v1425_v41 = vmax.f32 %v1384_v37, 0.0 }
 0x644   : > { %v1426_v42 = vmax.f32 %v1387_v39, 0.0 }
 0x646   : > { %v1436_v43 = vpack.c.bf16 %v1426_v42, %v1425_v41 }
 0x647   : > { %v1391_v45 = vpop.f32.mrb[84].mxu0 }
 0x648   : > { %v1392_v46 = vadd.f32 %v2989_v16, %v1391_v45  ;;  %v2373_v44 = vpop.f32.mrb[85].mxu0  ;;  %2412 = vmatmul.mubr.bf16.gmra.mrb[104].mxu1 %v1436_v43 }
 0x649   : > { %v1394_v47 = vpop.f32.mrb[86].mxu0  ;;  %2415 = vmatprep.mubr.msk.bf16.mxu1 %vm2609_vm0, %v2608_v0 }
 0x64a   : > { %v1395_v48 = vadd.f32 %v2989_v16, %v1394_v47  ;;  %v2374_v49 = vpop.f32.mrb[87].mxu0  ;;  %v1427_v50 = vmax.f32 %v1392_v46, 0.0 }
 0x64c   : > { %v1428_v52 = vmax.f32 %v1395_v48, 0.0 }
 0x64e   : > { %v1437_v53 = vpack.c.bf16 %v1428_v52, %v1427_v50 }
 0x64f   : > { %v1399_v51 = vpop.f32.mrb[88].mxu0 }
 0x650   : > { %v1400_v54 = vadd.f32 %v2989_v16, %v1399_v51  ;;  %v2377_v55 = vpop.f32.mrb[89].mxu0  ;;  %2416 = vmatmul.mubr.bf16.gmra.mrb[108].mxu1 %v1437_v53 }
 0x651   : > { %v1402_v56 = vpop.f32.mrb[90].mxu0  ;;  %2419 = vmatprep.mubr.msk.bf16.mxu1 %vm2609_vm0, %v2608_v0 }
 0x652   : > { %v1403_v57 = vadd.f32 %v2989_v16, %v1402_v56  ;;  %v2378_v59 = vpop.f32.mrb[91].mxu0  ;;  %v1429_v60 = vmax.f32 %v1400_v54, 0.0 }
 0x654   : > { %v1430_v58 = vmax.f32 %v1403_v57, 0.0 }
 0x656   : > { %v1438_v61 = vpack.c.bf16 %v1430_v58, %v1429_v60 }
 0x657   : > { %v1407_v62 = vpop.f32.mrb[92].mxu0 }
 0x658   : > { %v1408_v63 = vadd.f32 %v2989_v16, %v1407_v62  ;;  %v2381_v1 = vpop.f32.mrb[93].mxu0  ;;  %2420 = vmatmul.mubr.bf16.gmra.mrb[112].mxu1 %v1438_v61 }
 0x659   : > { %v1410_v3 = vpop.f32.mrb[94].mxu0  ;;  %2423 = vmatprep.mubr.msk.bf16.mxu1 %vm2609_vm0, %v2608_v0 }
 0x65a   : > { %v1411_v4 = vadd.f32 %v2989_v16, %v1410_v3  ;;  %v2382_v2 = vpop.f32.mrb[95].mxu0  ;;  %v1431_v5 = vmax.f32 %v1408_v63, 0.0 }
 0x65c   : > { %v1432_v6 = vmax.f32 %v1411_v4, 0.0 }
 0x65e   : > { %v1439_v7 = vpack.c.bf16 %v1432_v6, %v1431_v5 }
 0x65f   : > { %v1415_v8 = vpop.f32.mrb[96].mxu0 }
 0x660   : > { %v1416_v10 = vadd.f32 %v2989_v16, %v1415_v8  ;;  %2424 = vmatmul.mubr.bf16.gmra.mrb[116].mxu1 %v1439_v7  ;;  %v2385_v11 = vpop.f32.mrb[97].mxu0 }
 0x661   : > { %v1418_v9 = vpop.f32.mrb[98].mxu0  ;;  %2427 = vmatprep.mubr.msk.bf16.mxu1 %vm2609_vm0, %v2608_v0 }
 0x662   : > { %v1433_v12 = vmax.f32 %v1416_v10, 0.0  ;;  %v2386_v13 = vpop.f32.mrb[99].mxu0 }
 0x664   : > { %v1440_v14 = vpack.c.bf16 %v1433_v12, %v1433_v12 }
 0x668   : > { %2428 = vmatmul.mubr.bf16.gmra.mrb[120].mxu1 %v1440_v14 }
 0x70b   : > { %v1548_v18 = vpop.f32.mrb[96].mxu1 }
 0x70c   : > { %v1549_v16 = vadd.f32 %v3019_v17, %v1548_v18  ;;  %v2405_v19 = vpop.f32.mrb[97].mxu1 }
 0x70d   : > { %v1551_v20 = vpop.f32.mrb[98].mxu1 }
 0x70e   : > { %v1552_v21 = vadd.f32 %v3019_v17, %v1551_v20  ;;  %v2406_v22 = vpop.f32.mrb[99].mxu1  ;;  %v1602_v23 = vmax.f32 %v1549_v16, 0.0 }
 0x710   : > { %v1603_v24 = vmax.f32 %v1552_v21, 0.0 }
 0x712   : > { %v1615_v25 = vpack.c.bf16 %v1603_v24, %v1602_v23 }
 0x713   : > { %v1556_v26 = vpop.f32.mrb[100].mxu1 }
 0x714   : > { %v1557_v27 = vadd.f32 %v3019_v17, %v1556_v26  ;;  %v2409_v28 = vpop.f32.mrb[101].mxu1  ;;  %2448 = vmatmul.mubr.bf16.vlgmr.msra.gmra.mrb[100].mxu0 %v1615_v25 }
 0x715   : > { %v1559_v29 = vpop.f32.mrb[102].mxu1  ;;  %2451 = vmatprep.mubr.msk.bf16.mxu0 %vm2609_vm0, %v2608_v0 }
 0x716   : > { %v1560_v30 = vadd.f32 %v3019_v17, %v1559_v29  ;;  %v2410_v31 = vpop.f32.mrb[103].mxu1  ;;  %v1604_v32 = vmax.f32 %v1557_v27, 0.0 }
 0x718   : > { %v1605_v33 = vmax.f32 %v1560_v30, 0.0 }
 0x71a   : > { %v1616_v34 = vpack.c.bf16 %v1605_v33, %v1604_v32 }
 0x71b   : > { %v1564_v35 = vpop.f32.mrb[104].mxu1 }
 0x71c   : > { %v1565_v37 = vadd.f32 %v3019_v17, %v1564_v35  ;;  %v2413_v38 = vpop.f32.mrb[105].mxu1  ;;  %2452 = vmatmul.mubr.bf16.gmra.mrb[104].mxu0 %v1616_v34 }
 0x71d   : > { %v1567_v36 = vpop.f32.mrb[106].mxu1  ;;  %2455 = vmatprep.mubr.msk.bf16.mxu0 %vm2609_vm0, %v2608_v0 }
 0x71e   : > { %v1568_v39 = vadd.f32 %v3019_v17, %v1567_v36  ;;  %v2414_v40 = vpop.f32.mrb[107].mxu1  ;;  %v1606_v41 = vmax.f32 %v1565_v37, 0.0 }
 0x720   : > { %v1607_v42 = vmax.f32 %v1568_v39, 0.0 }
 0x722   : > { %v1617_v43 = vpack.c.bf16 %v1607_v42, %v1606_v41 }
 0x723   : > { %v1572_v45 = vpop.f32.mrb[108].mxu1 }
 0x724   : > { %v1573_v46 = vadd.f32 %v3019_v17, %v1572_v45  ;;  %v2417_v44 = vpop.f32.mrb[109].mxu1  ;;  %2456 = vmatmul.mubr.bf16.gmra.mrb[108].mxu0 %v1617_v43 }
 0x725   : > { %v1575_v47 = vpop.f32.mrb[110].mxu1  ;;  %2459 = vmatprep.mubr.msk.bf16.mxu0 %vm2609_vm0, %v2608_v0 }
 0x726   : > { %v1576_v48 = vadd.f32 %v3019_v17, %v1575_v47  ;;  %v2418_v49 = vpop.f32.mrb[111].mxu1  ;;  %v1608_v50 = vmax.f32 %v1573_v46, 0.0 }
 0x728   : > { %v1609_v52 = vmax.f32 %v1576_v48, 0.0 }
 0x72a   : > { %v1618_v53 = vpack.c.bf16 %v1609_v52, %v1608_v50 }
 0x72b   : > { %v1580_v51 = vpop.f32.mrb[112].mxu1 }
 0x72c   : > { %v1581_v54 = vadd.f32 %v3019_v17, %v1580_v51  ;;  %v2421_v55 = vpop.f32.mrb[113].mxu1  ;;  %2460 = vmatmul.mubr.bf16.gmra.mrb[112].mxu0 %v1618_v53 }
 0x72d   : > { %v1583_v56 = vpop.f32.mrb[114].mxu1  ;;  %2463 = vmatprep.mubr.msk.bf16.mxu0 %vm2609_vm0, %v2608_v0 }
 0x72e   : > { %v1584_v57 = vadd.f32 %v3019_v17, %v1583_v56  ;;  %v2422_v59 = vpop.f32.mrb[115].mxu1  ;;  %v1610_v60 = vmax.f32 %v1581_v54, 0.0 }
 0x730   : > { %v1611_v58 = vmax.f32 %v1584_v57, 0.0 }
 0x732   : > { %v1619_v61 = vpack.c.bf16 %v1611_v58, %v1610_v60 }
 0x733   : > { %v1588_v62 = vpop.f32.mrb[116].mxu1 }
 0x734   : > { %v1589_v63 = vadd.f32 %v3019_v17, %v1588_v62  ;;  %v2425_v1 = vpop.f32.mrb[117].mxu1  ;;  %2464 = vmatmul.mubr.bf16.gmra.mrb[116].mxu0 %v1619_v61 }
 0x735   : > { %v1591_v3 = vpop.f32.mrb[118].mxu1  ;;  %2467 = vmatprep.mubr.msk.bf16.mxu0 %vm2609_vm0, %v2608_v0 }
 0x736   : > { %v1592_v4 = vadd.f32 %v3019_v17, %v1591_v3  ;;  %v2426_v2 = vpop.f32.mrb[119].mxu1  ;;  %v1612_v5 = vmax.f32 %v1589_v63, 0.0 }
 0x738   : > { %v1613_v6 = vmax.f32 %v1592_v4, 0.0 }
 0x73a   : > { %v1620_v7 = vpack.c.bf16 %v1613_v6, %v1612_v5 }
 0x73b   : > { %v1596_v8 = vpop.f32.mrb[120].mxu1 }
 0x73c   : > { %v1597_v10 = vadd.f32 %v3019_v17, %v1596_v8  ;;  %v2429_v11 = vpop.f32.mrb[121].mxu1  ;;  %2468 = vmatmul.mubr.bf16.gmra.mrb[120].mxu0 %v1620_v7 }
 0x73d   : > { %v1599_v9 = vpop.f32.mrb[122].mxu1  ;;  %2471 = vmatprep.mubr.msk.bf16.mxu0 %vm2609_vm0, %v2608_v0 }
 0x73e   : > { %v1614_v12 = vmax.f32 %v1597_v10, 0.0  ;;  %v2430_v13 = vpop.f32.mrb[123].mxu1 }
 0x740   : > { %v1621_v14 = vpack.c.bf16 %v1614_v12, %v1614_v12 }
 0x744   : > { %2472 = vmatmul.mubr.bf16.gmra.mrb[124].mxu0 %v1621_v14 }
 0x7e7   : > { %v1729_v17 = vpop.f32.mrb[100].mxu0 }
 0x7e8   : > { %v1730_v0 = vadd.f32 %v1954_v15, %v1729_v17  ;;  %v2449_v18 = vpop.f32.mrb[101].mxu0 }
 0x7e9   : > { %v1732_v16 = vpop.f32.mrb[102].mxu0 }
 0x7ea   : > { %1784 = vst.msk [vmem:[%s3054_s30] sm:$0xff] %vm1783_vm2, %v1730_v0  ;;  %v1733_v19 = vadd.f32 %v1954_v15, %v1732_v16  ;;  %v2450_v20 = vpop.f32.mrb[103].mxu0 }
 0x7ec   : > { %1785 = vst.msk [vmem:[%s3054_s30 + $0x8] sm:$0xff] %vm1783_vm2, %v1733_v19 }
 0x7ef   : > { %v1737_v21 = vpop.f32.mrb[104].mxu0 }
 0x7f0   : > { %v1738_v22 = vadd.f32 %v1954_v15, %v1737_v21  ;;  %v2453_v23 = vpop.f32.mrb[105].mxu0 }
 0x7f1   : > { %v1740_v24 = vpop.f32.mrb[106].mxu0 }
 0x7f2   : > { %1786 = vst.msk [vmem:[%s3054_s30 + $0x10] sm:$0xff] %vm1783_vm2, %v1738_v22  ;;  %v1741_v25 = vadd.f32 %v1954_v15, %v1740_v24  ;;  %v2454_v26 = vpop.f32.mrb[107].mxu0 }
 0x7f4   : > { %1787 = vst.msk [vmem:[%s3054_s30 + $0x18] sm:$0xff] %vm1783_vm2, %v1741_v25 }
 0x7f7   : > { %v1745_v27 = vpop.f32.mrb[108].mxu0 }
 0x7f8   : > { %v1746_v28 = vadd.f32 %v1954_v15, %v1745_v27  ;;  %v2457_v29 = vpop.f32.mrb[109].mxu0 }
 0x7f9   : > { %v1748_v30 = vpop.f32.mrb[110].mxu0 }
 0x7fa   : > { %1788 = vst.msk [vmem:[%s3054_s30 + $0x20] sm:$0xff] %vm1783_vm2, %v1746_v28  ;;  %v1749_v31 = vadd.f32 %v1954_v15, %v1748_v30  ;;  %v2458_v32 = vpop.f32.mrb[111].mxu0 }
 0x7fc   : > { %1789 = vst.msk [vmem:[%s3054_s30 + $0x28] sm:$0xff] %vm1783_vm2, %v1749_v31 }
 0x7ff   : > { %v1753_v33 = vpop.f32.mrb[112].mxu0 }
 0x800   : > { %v1754_v34 = vadd.f32 %v1954_v15, %v1753_v33  ;;  %v2461_v35 = vpop.f32.mrb[113].mxu0 }
 0x801   : > { %v1756_v37 = vpop.f32.mrb[114].mxu0 }
 0x802   : > { %1790 = vst.msk [vmem:[%s3054_s30 + $0x30] sm:$0xff] %vm1783_vm2, %v1754_v34  ;;  %v1757_v38 = vadd.f32 %v1954_v15, %v1756_v37  ;;  %v2462_v36 = vpop.f32.mrb[115].mxu0 }
 0x804   : > { %1791 = vst.msk [vmem:[%s3054_s30 + $0x38] sm:$0xff] %vm1783_vm2, %v1757_v38 }
 0x807   : > { %v1761_v39 = vpop.f32.mrb[116].mxu0 }
 0x808   : > { %v1762_v40 = vadd.f32 %v1954_v15, %v1761_v39  ;;  %v2465_v41 = vpop.f32.mrb[117].mxu0 }
 0x809   : > { %v1764_v42 = vpop.f32.mrb[118].mxu0 }
 0x80a   : > { %1792 = vst.msk [vmem:[%s3054_s30 + $0x40] sm:$0xff] %vm1783_vm2, %v1762_v40  ;;  %v1765_v43 = vadd.f32 %v1954_v15, %v1764_v42  ;;  %v2466_v45 = vpop.f32.mrb[119].mxu0 }
 0x80c   : > { %1793 = vst.msk [vmem:[%s3054_s30 + $0x48] sm:$0xff] %vm1783_vm2, %v1765_v43 }
 0x80f   : > { %v1769_v46 = vpop.f32.mrb[120].mxu0 }
 0x810   : > { %v1770_v44 = vadd.f32 %v1954_v15, %v1769_v46  ;;  %v2469_v47 = vpop.f32.mrb[121].mxu0 }
 0x811   : > { %v1772_v48 = vpop.f32.mrb[122].mxu0 }
 0x812   : > { %1794 = vst.msk [vmem:[%s3054_s30 + $0x50] sm:$0xff] %vm1783_vm2, %v1770_v44  ;;  %v1773_v49 = vadd.f32 %v1954_v15, %v1772_v48  ;;  %v2470_v50 = vpop.f32.mrb[123].mxu0 }
 0x814   : > { %1795 = vst.msk [vmem:[%s3054_s30 + $0x58] sm:$0xff] %vm1783_vm2, %v1773_v49 }
 0x817   : > { %v1777_v52 = vpop.f32.mrb[124].mxu0 }
 0x818   : > { %v1778_v53 = vadd.f32 %v1954_v15, %v1777_v52  ;;  %v2473_v51 = vpop.f32.mrb[125].mxu0 }
 0x819   : > { %v1780_v54 = vpop.f32.mrb[126].mxu0 }
 0x81a   : > { %1796 = vst.msk [vmem:[%s3054_s30 + $0x60] sm:$0xff] %vm1783_vm2, %v1778_v53  ;;  %v2474_v55 = vpop.f32.mrb[127].mxu0 }
 0x81b PF: > { %s14_s12 = sadd.s32 1, %s2603_s12  }
 0x81c   : > { %p11_p3 = scmp.ge.s32.totalorder %s14_s12, 4  }
 0x81e   :  { %13 = sbr.rel (!%p11_p3) target bundleno = 1 (0x1), region = 83 }
 0x825   :  { %1819 = vsyncpa [#allocation3], 1 }
 0x826   :  { %1821 = vsyncpa [#allocation3 + $0x1], 1 }

</bundles_post_ra>
